<compile_context>
chip_gen: v6e
topology: v6e:2x2x1
jax: 0.10.0
libtpu: 0.0.40
codegen_flags: <defaults>
</compile_context>

<pallas_src>
import jax
import jax.numpy as jnp
from jax.experimental import pallas as pl
from jax.experimental.pallas import tpu as pltpu

EPS = 1e-5


def _pack_conv_weight(w, W):
    """(C_out, C_in, 3, 3) torch-layout conv weight -> (3, W*C_in, W*C_out).
    Block ky maps activation row h+ky-1 (packed as W*C_in lanes) to output row
    h (packed as W*C_out lanes); the kx taps and the W-direction zero padding
    are baked into the block-Toeplitz structure (out-of-range taps are zero)."""
    C_out, C_in = w.shape[0], w.shape[1]
    taps = jnp.transpose(w, (2, 3, 1, 0))                 # (ky, kx, ci, co)
    win = jnp.arange(W)[:, None]                          # input column
    wout = jnp.arange(W)[None, :]                         # output column
    kx = win - wout + 1                                   # tap index, valid in [0, 3)
    valid = ((kx >= 0) & (kx <= 2)).astype(w.dtype)
    blocks = taps[:, jnp.clip(kx, 0, 2)] * valid[None, :, :, None, None]
    # (ky, win, wout, ci, co) -> (ky, win, ci, wout, co) -> (3, W*C_in, W*C_out)
    return jnp.transpose(blocks, (0, 1, 3, 2, 4)).reshape(3, W * C_in, W * C_out)


def _channel_gather_mat(n_in, n_out, C):
    """0/1 matrix G with G[i, j] = (i % C == j % C): a row of per-lane column
    sums @ G reduces over the lane groups of the packed (.. * C + c) layout AND
    broadcasts the per-channel result back to the packed lane layout."""
    i = jnp.arange(n_in)[:, None] % C
    j = jnp.arange(n_out)[None, :] % C
    return (i == j).astype(jnp.float32)


def _pick_sample_block(N, H, row_target=256):
    """Largest Nb dividing N with Nb*H <= row_target, preferring >= 2 grid
    steps so the two TensorCores on v7x both get work."""
    cands = [nb for nb in range(1, N + 1) if N % nb == 0 and nb * H <= row_target]
    if not cands:
        cands = [1]
    multi = [nb for nb in cands if N // nb >= 2]
    return max(multi) if multi else max(cands)


def adain_resblock(x_nchw, z_nchw, w0, b0, w1, b1):
    """x: (N,C,H,W), z: (N,C,Hz,Wz), w*: (C,C,3,3), b*: (C,). Returns NCHW.
    The conv biases are intentionally unused: a per-channel constant added
    before AdaIN cancels exactly (it only shifts the channel mean)."""
    del b0, b1
    N, C, H, W = x_nchw.shape
    Nz, Cz, Hz, Wz = z_nchw.shape
    assert Cz == C and Nz == N
    WC = W * C
    HW, HWz = H * W, Hz * Wz
    f32 = jnp.float32

    Nb = _pick_sample_block(N, H)
    G = N // Nb
    NbH = Nb * H

    # ---- lane-dense packing -------------------------------------------------
    # content: rows are sample-major (N*H), lanes are w*C + c  -> (N*H, W*C)
    x = jnp.transpose(x_nchw, (0, 2, 3, 1)).reshape(N * H, WC).astype(f32)
    # style: fold Hz*Wz*C per sample into (Rz, Lz) with Lz a multiple of C and
    # >= 128 lanes when possible (full-width loads / gather).
    Lz = Wz * C
    total_z = Hz * Wz * C
    while Lz < 128 and total_z % (2 * Lz) == 0:
        Lz *= 2
    Rz = total_z // Lz
    z = jnp.transpose(z_nchw, (0, 2, 3, 1)).reshape(N, Rz, Lz).astype(f32)

    # Conv weights as 3 ky blocks (bias dropped; it cancels under AdaIN).
    # NOTE: kept f32 - casting these + activations to bf16 is a drop-in 2x MXU
    # switch at larger shapes; this block is latency-bound at this size.
    # TODO(synk): at much larger W*C the dense Toeplitz blocks grow as 3*(W*C)^2
    # and would need K-tiling / Buffered(1) on v7x's 64 MiB VMEM.
    w0m = _pack_conv_weight(w0.astype(f32), W)            # (3, WC, WC)
    w1m = _pack_conv_weight(w1.astype(f32), W)
    gs = _channel_gather_mat(Lz, WC, C)                   # (Lz, WC) style gather
    gc = _channel_gather_mat(WC, WC, C)                   # (WC, WC) content gather

    # ky-tap boundary masks (resident constants): zero rows whose rolled
    # neighbour crossed an image-height / sample boundary.
    hidx = jnp.arange(NbH) % H
    m_dn = (hidx != 0).astype(f32)[:, None]
    m_up = (hidx != H - 1).astype(f32)[:, None]
    masks = jnp.stack([jnp.broadcast_to(m_dn, (NbH, WC)),
                       jnp.broadcast_to(m_up, (NbH, WC))], axis=0)  # (2,NbH,WC)

    def kernel(x_ref, z_ref, m_ref, w0_ref, w1_ref, gs_ref, gc_ref, out_ref,
               zlhs_sc, zstat_sc, clhs_sc, cstat_sc):
        xs = x_ref[...]                                   # (NbH, WC)
        mask_dn = m_ref[0]                                # (NbH, WC)
        mask_up = m_ref[1]

        # ---- style statistics: per-sample [sum; sum-sq] rows stacked into a
        #      (2*Nb, Lz) LHS -> ONE gather matmul broadcasts the per-channel
        #      totals into the packed (w*C + c) lane layout. ----
        for n in range(Nb):
            zn = z_ref[n]                                 # (Rz, Lz)
            zlhs_sc[pl.ds(n, 1), :] = jnp.sum(zn, axis=0, keepdims=True)
            zlhs_sc[pl.ds(Nb + n, 1), :] = jnp.sum(zn * zn, axis=0, keepdims=True)
        zstat_sc[...] = jnp.dot(zlhs_sc[...], gs_ref[...],
                                preferred_element_type=f32)          # (2Nb, WC)

        def conv3x3(a, w_ref):
            # ky taps via XLU sublane rolls + resident boundary masks; kx taps
            # and W-padding live inside the block-Toeplitz ky blocks.  All Nb
            # samples are batched in the matmul M dimension.
            dn = pltpu.roll(a, shift=1, axis=0) * mask_dn            # row h-1
            up = pltpu.roll(a, shift=NbH - 1, axis=0) * mask_up      # row h+1
            y = jnp.dot(a, w_ref[1], preferred_element_type=f32)
            y = y + jnp.dot(dn, w_ref[0], preferred_element_type=f32)
            y = y + jnp.dot(up, w_ref[2], preferred_element_type=f32)
            return y                                                 # no bias

        def adain_relu(h):
            # content stats: same stacked-rows + single gather matmul trick.
            for n in range(Nb):
                hn = h[n * H:(n + 1) * H]
                clhs_sc[pl.ds(n, 1), :] = jnp.sum(hn, axis=0, keepdims=True)
                clhs_sc[pl.ds(Nb + n, 1), :] = jnp.sum(hn * hn, axis=0,
                                                       keepdims=True)
            cstat_sc[...] = jnp.dot(clhs_sc[...], gc_ref[...],
                                    preferred_element_type=f32)      # (2Nb, WC)
            outs = []
            for n in range(Nb):
                z_mean = zstat_sc[pl.ds(n, 1), :] / HWz
                z_var = (zstat_sc[pl.ds(Nb + n, 1), :]
                         - HWz * z_mean * z_mean) / (HWz - 1) + EPS
                z_std = jnp.sqrt(z_var)
                c_mean = cstat_sc[pl.ds(n, 1), :] / HW
                c_var = (cstat_sc[pl.ds(Nb + n, 1), :]
                         - HW * c_mean * c_mean) / (HW - 1) + EPS
                scale = z_std * jax.lax.rsqrt(c_var)                 # EUP rsqrt
                shift = z_mean - c_mean * scale
                hn = h[n * H:(n + 1) * H]
                outs.append(jnp.maximum(hn * scale + shift, 0.0))
            return jnp.concatenate(outs, axis=0) if Nb > 1 else outs[0]

        h = adain_relu(conv3x3(xs, w0_ref))
        h = adain_relu(conv3x3(h, w1_ref))
        out_ref[...] = h + xs                             # full 128-lane store

    out = pl.pallas_call(
        kernel,
        out_shape=jax.ShapeDtypeStruct((N * H, WC), f32),
        grid_spec=pltpu.PrefetchScalarGridSpec(
            num_scalar_prefetch=0,
            grid=(G,),
            in_specs=[
                pl.BlockSpec((NbH, WC), lambda g: (g, 0)),       # x (batched)
                pl.BlockSpec((Nb, Rz, Lz), lambda g: (g, 0, 0)), # z (batched)
                pl.BlockSpec((2, NbH, WC), lambda g: (0, 0, 0)), # masks (resident)
                pl.BlockSpec((3, WC, WC), lambda g: (0, 0, 0)),  # w0 Toeplitz
                pl.BlockSpec((3, WC, WC), lambda g: (0, 0, 0)),  # w1 Toeplitz
                pl.BlockSpec((Lz, WC), lambda g: (0, 0)),        # style gather
                pl.BlockSpec((WC, WC), lambda g: (0, 0)),        # content gather
            ],
            out_specs=pl.BlockSpec((NbH, WC), lambda g: (g, 0)),
            scratch_shapes=[
                pltpu.VMEM((2 * Nb, Lz), f32),   # stacked z [sum; sumsq] rows
                pltpu.VMEM((2 * Nb, WC), f32),   # gathered z stats
                pltpu.VMEM((2 * Nb, WC), f32),   # stacked content stat rows
                pltpu.VMEM((2 * Nb, WC), f32),   # gathered content stats
            ],
        ),
        compiler_params=pltpu.CompilerParams(dimension_semantics=("parallel",)),
    )(x, z, masks, w0m, w1m, gs, gc)

    return jnp.transpose(out.reshape(N, H, W, C), (0, 3, 1, 2))      # back to NCHW


def reference(x, z, w0, b0, w1, b1):
    """Pure-JAX replica of the PyTorch forward (NCHW), biases included."""
    def conv(inp, w, b):
        y = jax.lax.conv_general_dilated(
            inp, w, window_strides=(1, 1), padding=((1, 1), (1, 1)),
            dimension_numbers=("NCHW", "OIHW", "NCHW"))
        return y + b[None, :, None, None]

    def calc_mean_std(f):
        n, c = f.shape[:2]
        ff = f.reshape(n, c, -1)
        mean = ff.mean(axis=2)[:, :, None, None]
        std = jnp.sqrt(ff.var(axis=2, ddof=1) + EPS)[:, :, None, None]
        return mean, std

    def adain(cf, sf):
        sm, ss = calc_mean_std(sf)
        cm, cs = calc_mean_std(cf)
        return (cf - cm) / cs * ss + sm

    h = conv(x, w0, b0)
    h = jax.nn.relu(adain(h, z))
    h = conv(h, w1, b1)
    h = jax.nn.relu(adain(h, z))
    return h + x


if __name__ == "__main__":
    key = jax.random.PRNGKey(0)
    k1, k2, k3, k4, k5, k6 = jax.random.split(key, 6)

    # Residual add requires in_ch == out_ch; W*C = 128 makes the packed layout
    # exactly one lane tile wide.  N=4 exercises both sample batching (Nb=2)
    # and a 2-step parallel grid.
    N, C, H, W = 4, 8, 16, 16
    Hz, Wz = 8, 8

    x = jax.random.normal(k1, (N, C, H, W), jnp.float32)
    z = jax.random.normal(k2, (N, C, Hz, Wz), jnp.float32)

    fan_in = C * 3 * 3
    bound = 1.0 / (fan_in ** 0.5)
    w0 = jax.random.uniform(k3, (C, C, 3, 3), jnp.float32, -bound, bound)
    b0 = jax.random.uniform(k4, (C,), jnp.float32, -bound, bound)
    w1 = jax.random.uniform(k5, (C, C, 3, 3), jnp.float32, -bound, bound)
    b1 = jax.random.uniform(k6, (C,), jnp.float32, -bound, bound)

    out = jax.jit(adain_resblock)(x, z, w0, b0, w1, b1)
    out = jax.block_until_ready(out)

    ref = reference(x, z, w0, b0, w1, b1)
    if not jnp.allclose(out, ref, rtol=1e-2, atol=1e-2):
        max_err = float(jnp.max(jnp.abs(out - ref)))
        raise AssertionError(f"Pallas kernel mismatch vs reference, max abs err={max_err}")
    print("KERNEL_OK")
</pallas_src>

<mosaic_0001>
module attributes {stable_mosaic.version = 11 : i64} {
  func.func @kernel(%arg0: i32, %arg1: memref<32x128xf32, #tpu.memory_space<vmem>>, %arg2: memref<2x4x128xf32, #tpu.memory_space<vmem>>, %arg3: memref<2x32x128xf32, #tpu.memory_space<vmem>>, %arg4: memref<3x128x128xf32, #tpu.memory_space<vmem>>, %arg5: memref<3x128x128xf32, #tpu.memory_space<vmem>>, %arg6: memref<128x128xf32, #tpu.memory_space<vmem>>, %arg7: memref<128x128xf32, #tpu.memory_space<vmem>>, %arg8: memref<32x128xf32, #tpu.memory_space<vmem>>, %arg9: memref<4x128xf32, #tpu.memory_space<vmem>>, %arg10: memref<4x128xf32, #tpu.memory_space<vmem>>, %arg11: memref<4x128xf32, #tpu.memory_space<vmem>>, %arg12: memref<4x128xf32, #tpu.memory_space<vmem>>) attributes {dimension_semantics = [#tpu.dimension_semantics<parallel>], iteration_bounds = array<i64: 2>, scalar_prefetch = 0 : i64, scratch_operands = 4 : i64, tpu.core_type = #tpu.core_type<tc>, window_params = [{transform_indices = @transform_0, window_bounds = array<i64: 32, 128>}, {transform_indices = @transform_1, window_bounds = array<i64: 2, 4, 128>}, {pipeline_mode = #tpu.pipeline_mode<synchronous>, transform_indices = @transform_2, window_bounds = array<i64: 2, 32, 128>}, {pipeline_mode = #tpu.pipeline_mode<synchronous>, transform_indices = @transform_3, window_bounds = array<i64: 3, 128, 128>}, {pipeline_mode = #tpu.pipeline_mode<synchronous>, transform_indices = @transform_4, window_bounds = array<i64: 3, 128, 128>}, {pipeline_mode = #tpu.pipeline_mode<synchronous>, transform_indices = @transform_5, window_bounds = array<i64: 128, 128>}, {pipeline_mode = #tpu.pipeline_mode<synchronous>, transform_indices = @transform_6, window_bounds = array<i64: 128, 128>}, {transform_indices = @transform_7, window_bounds = array<i64: 32, 128>}]} {
    %c0 = arith.constant 0 : index
    %c0_0 = arith.constant 0 : index
    %0 = vector.load %arg1[%c0, %c0_0] : memref<32x128xf32, #tpu.memory_space<vmem>>, vector<32x128xf32>
    %c0_1 = arith.constant 0 : index
    %c0_2 = arith.constant 0 : index
    %c0_3 = arith.constant 0 : index
    %1 = vector.load %arg3[%c0_1, %c0_2, %c0_3] : memref<2x32x128xf32, #tpu.memory_space<vmem>>, vector<1x32x128xf32>
    %2 = vector.shape_cast %1 : vector<1x32x128xf32> to vector<32x128xf32>
    %c1 = arith.constant 1 : index
    %c0_4 = arith.constant 0 : index
    %c0_5 = arith.constant 0 : index
    %3 = vector.load %arg3[%c1, %c0_4, %c0_5] : memref<2x32x128xf32, #tpu.memory_space<vmem>>, vector<1x32x128xf32>
    %4 = vector.shape_cast %3 : vector<1x32x128xf32> to vector<32x128xf32>
    %c0_6 = arith.constant 0 : index
    %c0_7 = arith.constant 0 : index
    %c0_8 = arith.constant 0 : index
    %5 = vector.load %arg2[%c0_6, %c0_7, %c0_8] : memref<2x4x128xf32, #tpu.memory_space<vmem>>, vector<1x4x128xf32>
    %6 = vector.shape_cast %5 : vector<1x4x128xf32> to vector<4x128xf32>
    %cst = arith.constant dense<0.000000e+00> : vector<128xf32>
    %7 = vector.multi_reduction <add>, %6, %cst [0] : vector<4x128xf32> to vector<128xf32>
    %8 = vector.shape_cast %7 : vector<128xf32> to vector<1x128xf32>
    %c0_9 = arith.constant 0 : index
    %c0_10 = arith.constant 0 : index
    %9 = vector.load %arg9[%c0_9, %c0_10] : memref<4x128xf32, #tpu.memory_space<vmem>>, vector<1x128xf32>
    tpu.vector_store %arg9[%c0_9, %c0_10], %8 {strides = array<i32>} : memref<4x128xf32, #tpu.memory_space<vmem>>, vector<1x128xf32>,
    %10 = arith.mulf %6, %6 : vector<4x128xf32>
    %cst_11 = arith.constant dense<0.000000e+00> : vector<128xf32>
    %11 = vector.multi_reduction <add>, %10, %cst_11 [0] : vector<4x128xf32> to vector<128xf32>
    %12 = vector.shape_cast %11 : vector<128xf32> to vector<1x128xf32>
    %c2 = arith.constant 2 : index
    %c0_12 = arith.constant 0 : index
    %13 = vector.load %arg9[%c2, %c0_12] : memref<4x128xf32, #tpu.memory_space<vmem>>, vector<1x128xf32>
    tpu.vector_store %arg9[%c2, %c0_12], %12 {strides = array<i32>} : memref<4x128xf32, #tpu.memory_space<vmem>>, vector<1x128xf32>,
    %c1_13 = arith.constant 1 : index
    %c0_14 = arith.constant 0 : index
    %c0_15 = arith.constant 0 : index
    %14 = vector.load %arg2[%c1_13, %c0_14, %c0_15] : memref<2x4x128xf32, #tpu.memory_space<vmem>>, vector<1x4x128xf32>
    %15 = vector.shape_cast %14 : vector<1x4x128xf32> to vector<4x128xf32>
    %cst_16 = arith.constant dense<0.000000e+00> : vector<128xf32>
    %16 = vector.multi_reduction <add>, %15, %cst_16 [0] : vector<4x128xf32> to vector<128xf32>
    %17 = vector.shape_cast %16 : vector<128xf32> to vector<1x128xf32>
    %c1_17 = arith.constant 1 : index
    %c0_18 = arith.constant 0 : index
    %18 = vector.load %arg9[%c1_17, %c0_18] : memref<4x128xf32, #tpu.memory_space<vmem>>, vector<1x128xf32>
    tpu.vector_store %arg9[%c1_17, %c0_18], %17 {strides = array<i32>} : memref<4x128xf32, #tpu.memory_space<vmem>>, vector<1x128xf32>,
    %19 = arith.mulf %15, %15 : vector<4x128xf32>
    %cst_19 = arith.constant dense<0.000000e+00> : vector<128xf32>
    %20 = vector.multi_reduction <add>, %19, %cst_19 [0] : vector<4x128xf32> to vector<128xf32>
    %21 = vector.shape_cast %20 : vector<128xf32> to vector<1x128xf32>
    %c3 = arith.constant 3 : index
    %c0_20 = arith.constant 0 : index
    %22 = vector.load %arg9[%c3, %c0_20] : memref<4x128xf32, #tpu.memory_space<vmem>>, vector<1x128xf32>
    tpu.vector_store %arg9[%c3, %c0_20], %21 {strides = array<i32>} : memref<4x128xf32, #tpu.memory_space<vmem>>, vector<1x128xf32>,
    %c0_21 = arith.constant 0 : index
    %c0_22 = arith.constant 0 : index
    %23 = vector.load %arg9[%c0_21, %c0_22] : memref<4x128xf32, #tpu.memory_space<vmem>>, vector<4x128xf32>
    %c0_23 = arith.constant 0 : index
    %c0_24 = arith.constant 0 : index
    %24 = vector.load %arg6[%c0_23, %c0_24] : memref<128x128xf32, #tpu.memory_space<vmem>>, vector<128x128xf32>
    %cst_25 = arith.constant dense<0.000000e+00> : vector<4x128xf32>
    %25 = tpu.matmul %23, %24, %cst_25 {dimension_numbers = #tpu.dot_dimension_numbers<[1], [0], [0], [1], [0, 0, 1, 1], [], []>} : vector<4x128xf32>, vector<128x128xf32>, vector<4x128xf32> -> vector<4x128xf32>
    %c0_26 = arith.constant 0 : index
    %c0_27 = arith.constant 0 : index
    %26 = vector.load %arg10[%c0_26, %c0_27] : memref<4x128xf32, #tpu.memory_space<vmem>>, vector<4x128xf32>
    tpu.vector_store %arg10[%c0_26, %c0_27], %25 {strides = array<i32>} : memref<4x128xf32, #tpu.memory_space<vmem>>, vector<4x128xf32>,
    %c1_i32 = arith.constant 1 : i32
    %27 = tpu.dynamic_rotate %0 by %c1_i32 dim 0 : vector<32x128xf32>, i32 -> vector<32x128xf32>
    %28 = arith.mulf %27, %2 : vector<32x128xf32>
    %c31_i32 = arith.constant 31 : i32
    %29 = tpu.dynamic_rotate %0 by %c31_i32 dim 0 : vector<32x128xf32>, i32 -> vector<32x128xf32>
    %30 = arith.mulf %29, %4 : vector<32x128xf32>
    %c1_28 = arith.constant 1 : index
    %c0_29 = arith.constant 0 : index
    %c0_30 = arith.constant 0 : index
    %31 = vector.load %arg4[%c1_28, %c0_29, %c0_30] : memref<3x128x128xf32, #tpu.memory_space<vmem>>, vector<1x128x128xf32>
    %32 = vector.shape_cast %31 : vector<1x128x128xf32> to vector<128x128xf32>
    %cst_31 = arith.constant dense<0.000000e+00> : vector<32x128xf32>
    %33 = tpu.matmul %0, %32, %cst_31 {dimension_numbers = #tpu.dot_dimension_numbers<[1], [0], [0], [1], [0, 0, 1, 1], [], []>} : vector<32x128xf32>, vector<128x128xf32>, vector<32x128xf32> -> vector<32x128xf32>
    %c0_32 = arith.constant 0 : index
    %c0_33 = arith.constant 0 : index
    %c0_34 = arith.constant 0 : index
    %34 = vector.load %arg4[%c0_32, %c0_33, %c0_34] : memref<3x128x128xf32, #tpu.memory_space<vmem>>, vector<1x128x128xf32>
    %35 = vector.shape_cast %34 : vector<1x128x128xf32> to vector<128x128xf32>
    %cst_35 = arith.constant dense<0.000000e+00> : vector<32x128xf32>
    %36 = tpu.matmul %28, %35, %cst_35 {dimension_numbers = #tpu.dot_dimension_numbers<[1], [0], [0], [1], [0, 0, 1, 1], [], []>} : vector<32x128xf32>, vector<128x128xf32>, vector<32x128xf32> -> vector<32x128xf32>
    %37 = arith.addf %33, %36 : vector<32x128xf32>
    %c2_36 = arith.constant 2 : index
    %c0_37 = arith.constant 0 : index
    %c0_38 = arith.constant 0 : index
    %38 = vector.load %arg4[%c2_36, %c0_37, %c0_38] : memref<3x128x128xf32, #tpu.memory_space<vmem>>, vector<1x128x128xf32>
    %39 = vector.shape_cast %38 : vector<1x128x128xf32> to vector<128x128xf32>
    %cst_39 = arith.constant dense<0.000000e+00> : vector<32x128xf32>
    %40 = tpu.matmul %30, %39, %cst_39 {dimension_numbers = #tpu.dot_dimension_numbers<[1], [0], [0], [1], [0, 0, 1, 1], [], []>} : vector<32x128xf32>, vector<128x128xf32>, vector<32x128xf32> -> vector<32x128xf32>
    %41 = arith.addf %37, %40 : vector<32x128xf32>
    %42 = vector.extract_strided_slice %41 {offsets = [0, 0], sizes = [16, 128], strides = [1, 1]} : vector<32x128xf32> to vector<16x128xf32>
    %cst_40 = arith.constant dense<0.000000e+00> : vector<128xf32>
    %43 = vector.multi_reduction <add>, %42, %cst_40 [0] : vector<16x128xf32> to vector<128xf32>
    %44 = vector.shape_cast %43 : vector<128xf32> to vector<1x128xf32>
    %c0_41 = arith.constant 0 : index
    %c0_42 = arith.constant 0 : index
    %45 = vector.load %arg11[%c0_41, %c0_42] : memref<4x128xf32, #tpu.memory_space<vmem>>, vector<1x128xf32>
    tpu.vector_store %arg11[%c0_41, %c0_42], %44 {strides = array<i32>} : memref<4x128xf32, #tpu.memory_space<vmem>>, vector<1x128xf32>,
    %46 = arith.mulf %42, %42 : vector<16x128xf32>
    %cst_43 = arith.constant dense<0.000000e+00> : vector<128xf32>
    %47 = vector.multi_reduction <add>, %46, %cst_43 [0] : vector<16x128xf32> to vector<128xf32>
    %48 = vector.shape_cast %47 : vector<128xf32> to vector<1x128xf32>
    %c2_44 = arith.constant 2 : index
    %c0_45 = arith.constant 0 : index
    %49 = vector.load %arg11[%c2_44, %c0_45] : memref<4x128xf32, #tpu.memory_space<vmem>>, vector<1x128xf32>
    tpu.vector_store %arg11[%c2_44, %c0_45], %48 {strides = array<i32>} : memref<4x128xf32, #tpu.memory_space<vmem>>, vector<1x128xf32>,
    %50 = vector.extract_strided_slice %41 {offsets = [16, 0], sizes = [16, 128], strides = [1, 1]} : vector<32x128xf32> to vector<16x128xf32>
    %cst_46 = arith.constant dense<0.000000e+00> : vector<128xf32>
    %51 = vector.multi_reduction <add>, %50, %cst_46 [0] : vector<16x128xf32> to vector<128xf32>
    %52 = vector.shape_cast %51 : vector<128xf32> to vector<1x128xf32>
    %c1_47 = arith.constant 1 : index
    %c0_48 = arith.constant 0 : index
    %53 = vector.load %arg11[%c1_47, %c0_48] : memref<4x128xf32, #tpu.memory_space<vmem>>, vector<1x128xf32>
    tpu.vector_store %arg11[%c1_47, %c0_48], %52 {strides = array<i32>} : memref<4x128xf32, #tpu.memory_space<vmem>>, vector<1x128xf32>,
    %54 = arith.mulf %50, %50 : vector<16x128xf32>
    %cst_49 = arith.constant dense<0.000000e+00> : vector<128xf32>
    %55 = vector.multi_reduction <add>, %54, %cst_49 [0] : vector<16x128xf32> to vector<128xf32>
    %56 = vector.shape_cast %55 : vector<128xf32> to vector<1x128xf32>
    %c3_50 = arith.constant 3 : index
    %c0_51 = arith.constant 0 : index
    %57 = vector.load %arg11[%c3_50, %c0_51] : memref<4x128xf32, #tpu.memory_space<vmem>>, vector<1x128xf32>
    tpu.vector_store %arg11[%c3_50, %c0_51], %56 {strides = array<i32>} : memref<4x128xf32, #tpu.memory_space<vmem>>, vector<1x128xf32>,
    %c0_52 = arith.constant 0 : index
    %c0_53 = arith.constant 0 : index
    %58 = vector.load %arg11[%c0_52, %c0_53] : memref<4x128xf32, #tpu.memory_space<vmem>>, vector<4x128xf32>
    %c0_54 = arith.constant 0 : index
    %c0_55 = arith.constant 0 : index
    %59 = vector.load %arg7[%c0_54, %c0_55] : memref<128x128xf32, #tpu.memory_space<vmem>>, vector<128x128xf32>
    %cst_56 = arith.constant dense<0.000000e+00> : vector<4x128xf32>
    %60 = tpu.matmul %58, %59, %cst_56 {dimension_numbers = #tpu.dot_dimension_numbers<[1], [0], [0], [1], [0, 0, 1, 1], [], []>} : vector<4x128xf32>, vector<128x128xf32>, vector<4x128xf32> -> vector<4x128xf32>
    %c0_57 = arith.constant 0 : index
    %c0_58 = arith.constant 0 : index
    %61 = vector.load %arg12[%c0_57, %c0_58] : memref<4x128xf32, #tpu.memory_space<vmem>>, vector<4x128xf32>
    tpu.vector_store %arg12[%c0_57, %c0_58], %60 {strides = array<i32>} : memref<4x128xf32, #tpu.memory_space<vmem>>, vector<4x128xf32>,
    %c0_59 = arith.constant 0 : index
    %c0_60 = arith.constant 0 : index
    %62 = vector.load %arg10[%c0_59, %c0_60] : memref<4x128xf32, #tpu.memory_space<vmem>>, vector<1x128xf32>
    %cst_61 = arith.constant 6.400000e+01 : f32
    %63 = vector.broadcast %cst_61 : f32 to vector<1x128xf32>
    %64 = arith.divf %62, %63 : vector<1x128xf32>
    %c2_62 = arith.constant 2 : index
    %c0_63 = arith.constant 0 : index
    %65 = vector.load %arg10[%c2_62, %c0_63] : memref<4x128xf32, #tpu.memory_space<vmem>>, vector<1x128xf32>
    %cst_64 = arith.constant 6.400000e+01 : f32
    %66 = vector.broadcast %cst_64 : f32 to vector<1x128xf32>
    %67 = arith.mulf %66, %64 : vector<1x128xf32>
    %68 = arith.mulf %67, %64 : vector<1x128xf32>
    %69 = arith.subf %65, %68 : vector<1x128xf32>
    %cst_65 = arith.constant 6.300000e+01 : f32
    %70 = vector.broadcast %cst_65 : f32 to vector<1x128xf32>
    %71 = arith.divf %69, %70 : vector<1x128xf32>
    %cst_66 = arith.constant 9.99999974E-6 : f32
    %72 = vector.broadcast %cst_66 : f32 to vector<1x128xf32>
    %73 = arith.addf %71, %72 : vector<1x128xf32>
    %74 = math.sqrt %73 : vector<1x128xf32>
    %c0_67 = arith.constant 0 : index
    %c0_68 = arith.constant 0 : index
    %75 = vector.load %arg12[%c0_67, %c0_68] : memref<4x128xf32, #tpu.memory_space<vmem>>, vector<1x128xf32>
    %cst_69 = arith.constant 2.560000e+02 : f32
    %76 = vector.broadcast %cst_69 : f32 to vector<1x128xf32>
    %77 = arith.divf %75, %76 : vector<1x128xf32>
    %c2_70 = arith.constant 2 : index
    %c0_71 = arith.constant 0 : index
    %78 = vector.load %arg12[%c2_70, %c0_71] : memref<4x128xf32, #tpu.memory_space<vmem>>, vector<1x128xf32>
    %cst_72 = arith.constant 2.560000e+02 : f32
    %79 = vector.broadcast %cst_72 : f32 to vector<1x128xf32>
    %80 = arith.mulf %79, %77 : vector<1x128xf32>
    %81 = arith.mulf %80, %77 : vector<1x128xf32>
    %82 = arith.subf %78, %81 : vector<1x128xf32>
    %cst_73 = arith.constant 2.550000e+02 : f32
    %83 = vector.broadcast %cst_73 : f32 to vector<1x128xf32>
    %84 = arith.divf %82, %83 : vector<1x128xf32>
    %cst_74 = arith.constant 9.99999974E-6 : f32
    %85 = vector.broadcast %cst_74 : f32 to vector<1x128xf32>
    %86 = arith.addf %84, %85 : vector<1x128xf32>
    %87 = math.rsqrt %86 : vector<1x128xf32>
    %88 = arith.mulf %74, %87 : vector<1x128xf32>
    %89 = arith.mulf %77, %88 : vector<1x128xf32>
    %90 = arith.subf %64, %89 : vector<1x128xf32>
    %91 = vector.extract_strided_slice %41 {offsets = [0, 0], sizes = [16, 128], strides = [1, 1]} : vector<32x128xf32> to vector<16x128xf32>
    %92 = vector.broadcast %88 : vector<1x128xf32> to vector<16x128xf32>
    %93 = arith.mulf %91, %92 : vector<16x128xf32>
    %94 = vector.broadcast %90 : vector<1x128xf32> to vector<16x128xf32>
    %95 = arith.addf %93, %94 : vector<16x128xf32>
    %cst_75 = arith.constant 0.000000e+00 : f32
    %96 = vector.broadcast %cst_75 : f32 to vector<16x128xf32>
    %97 = arith.maximumf %95, %96 : vector<16x128xf32>
    %c1_76 = arith.constant 1 : index
    %c0_77 = arith.constant 0 : index
    %98 = vector.load %arg10[%c1_76, %c0_77] : memref<4x128xf32, #tpu.memory_space<vmem>>, vector<1x128xf32>
    %cst_78 = arith.constant 6.400000e+01 : f32
    %99 = vector.broadcast %cst_78 : f32 to vector<1x128xf32>
    %100 = arith.divf %98, %99 : vector<1x128xf32>
    %c3_79 = arith.constant 3 : index
    %c0_80 = arith.constant 0 : index
    %101 = vector.load %arg10[%c3_79, %c0_80] : memref<4x128xf32, #tpu.memory_space<vmem>>, vector<1x128xf32>
    %cst_81 = arith.constant 6.400000e+01 : f32
    %102 = vector.broadcast %cst_81 : f32 to vector<1x128xf32>
    %103 = arith.mulf %102, %100 : vector<1x128xf32>
    %104 = arith.mulf %103, %100 : vector<1x128xf32>
    %105 = arith.subf %101, %104 : vector<1x128xf32>
    %cst_82 = arith.constant 6.300000e+01 : f32
    %106 = vector.broadcast %cst_82 : f32 to vector<1x128xf32>
    %107 = arith.divf %105, %106 : vector<1x128xf32>
    %cst_83 = arith.constant 9.99999974E-6 : f32
    %108 = vector.broadcast %cst_83 : f32 to vector<1x128xf32>
    %109 = arith.addf %107, %108 : vector<1x128xf32>
    %110 = math.sqrt %109 : vector<1x128xf32>
    %c1_84 = arith.constant 1 : index
    %c0_85 = arith.constant 0 : index
    %111 = vector.load %arg12[%c1_84, %c0_85] : memref<4x128xf32, #tpu.memory_space<vmem>>, vector<1x128xf32>
    %cst_86 = arith.constant 2.560000e+02 : f32
    %112 = vector.broadcast %cst_86 : f32 to vector<1x128xf32>
    %113 = arith.divf %111, %112 : vector<1x128xf32>
    %c3_87 = arith.constant 3 : index
    %c0_88 = arith.constant 0 : index
    %114 = vector.load %arg12[%c3_87, %c0_88] : memref<4x128xf32, #tpu.memory_space<vmem>>, vector<1x128xf32>
    %cst_89 = arith.constant 2.560000e+02 : f32
    %115 = vector.broadcast %cst_89 : f32 to vector<1x128xf32>
    %116 = arith.mulf %115, %113 : vector<1x128xf32>
    %117 = arith.mulf %116, %113 : vector<1x128xf32>
    %118 = arith.subf %114, %117 : vector<1x128xf32>
    %cst_90 = arith.constant 2.550000e+02 : f32
    %119 = vector.broadcast %cst_90 : f32 to vector<1x128xf32>
    %120 = arith.divf %118, %119 : vector<1x128xf32>
    %cst_91 = arith.constant 9.99999974E-6 : f32
    %121 = vector.broadcast %cst_91 : f32 to vector<1x128xf32>
    %122 = arith.addf %120, %121 : vector<1x128xf32>
    %123 = math.rsqrt %122 : vector<1x128xf32>
    %124 = arith.mulf %110, %123 : vector<1x128xf32>
    %125 = arith.mulf %113, %124 : vector<1x128xf32>
    %126 = arith.subf %100, %125 : vector<1x128xf32>
    %127 = vector.extract_strided_slice %41 {offsets = [16, 0], sizes = [16, 128], strides = [1, 1]} : vector<32x128xf32> to vector<16x128xf32>
    %128 = vector.broadcast %124 : vector<1x128xf32> to vector<16x128xf32>
    %129 = arith.mulf %127, %128 : vector<16x128xf32>
    %130 = vector.broadcast %126 : vector<1x128xf32> to vector<16x128xf32>
    %131 = arith.addf %129, %130 : vector<16x128xf32>
    %cst_92 = arith.constant 0.000000e+00 : f32
    %132 = vector.broadcast %cst_92 : f32 to vector<16x128xf32>
    %133 = arith.maximumf %131, %132 : vector<16x128xf32>
    %134 = tpu.concatenate %97, %133 in 0 : vector<16x128xf32>, vector<16x128xf32> -> vector<32x128xf32>
    %c1_i32_93 = arith.constant 1 : i32
    %135 = tpu.dynamic_rotate %134 by %c1_i32_93 dim 0 : vector<32x128xf32>, i32 -> vector<32x128xf32>
    %136 = arith.mulf %135, %2 : vector<32x128xf32>
    %c31_i32_94 = arith.constant 31 : i32
    %137 = tpu.dynamic_rotate %134 by %c31_i32_94 dim 0 : vector<32x128xf32>, i32 -> vector<32x128xf32>
    %138 = arith.mulf %137, %4 : vector<32x128xf32>
    %c1_95 = arith.constant 1 : index
    %c0_96 = arith.constant 0 : index
    %c0_97 = arith.constant 0 : index
    %139 = vector.load %arg5[%c1_95, %c0_96, %c0_97] : memref<3x128x128xf32, #tpu.memory_space<vmem>>, vector<1x128x128xf32>
    %140 = vector.shape_cast %139 : vector<1x128x128xf32> to vector<128x128xf32>
    %cst_98 = arith.constant dense<0.000000e+00> : vector<32x128xf32>
    %141 = tpu.matmul %134, %140, %cst_98 {dimension_numbers = #tpu.dot_dimension_numbers<[1], [0], [0], [1], [0, 0, 1, 1], [], []>} : vector<32x128xf32>, vector<128x128xf32>, vector<32x128xf32> -> vector<32x128xf32>
    %c0_99 = arith.constant 0 : index
    %c0_100 = arith.constant 0 : index
    %c0_101 = arith.constant 0 : index
    %142 = vector.load %arg5[%c0_99, %c0_100, %c0_101] : memref<3x128x128xf32, #tpu.memory_space<vmem>>, vector<1x128x128xf32>
    %143 = vector.shape_cast %142 : vector<1x128x128xf32> to vector<128x128xf32>
    %cst_102 = arith.constant dense<0.000000e+00> : vector<32x128xf32>
    %144 = tpu.matmul %136, %143, %cst_102 {dimension_numbers = #tpu.dot_dimension_numbers<[1], [0], [0], [1], [0, 0, 1, 1], [], []>} : vector<32x128xf32>, vector<128x128xf32>, vector<32x128xf32> -> vector<32x128xf32>
    %145 = arith.addf %141, %144 : vector<32x128xf32>
    %c2_103 = arith.constant 2 : index
    %c0_104 = arith.constant 0 : index
    %c0_105 = arith.constant 0 : index
    %146 = vector.load %arg5[%c2_103, %c0_104, %c0_105] : memref<3x128x128xf32, #tpu.memory_space<vmem>>, vector<1x128x128xf32>
    %147 = vector.shape_cast %146 : vector<1x128x128xf32> to vector<128x128xf32>
    %cst_106 = arith.constant dense<0.000000e+00> : vector<32x128xf32>
    %148 = tpu.matmul %138, %147, %cst_106 {dimension_numbers = #tpu.dot_dimension_numbers<[1], [0], [0], [1], [0, 0, 1, 1], [], []>} : vector<32x128xf32>, vector<128x128xf32>, vector<32x128xf32> -> vector<32x128xf32>
    %149 = arith.addf %145, %148 : vector<32x128xf32>
    %150 = vector.extract_strided_slice %149 {offsets = [0, 0], sizes = [16, 128], strides = [1, 1]} : vector<32x128xf32> to vector<16x128xf32>
    %cst_107 = arith.constant dense<0.000000e+00> : vector<128xf32>
    %151 = vector.multi_reduction <add>, %150, %cst_107 [0] : vector<16x128xf32> to vector<128xf32>
    %152 = vector.shape_cast %151 : vector<128xf32> to vector<1x128xf32>
    %c0_108 = arith.constant 0 : index
    %c0_109 = arith.constant 0 : index
    %153 = vector.load %arg11[%c0_108, %c0_109] : memref<4x128xf32, #tpu.memory_space<vmem>>, vector<1x128xf32>
    tpu.vector_store %arg11[%c0_108, %c0_109], %152 {strides = array<i32>} : memref<4x128xf32, #tpu.memory_space<vmem>>, vector<1x128xf32>,
    %154 = arith.mulf %150, %150 : vector<16x128xf32>
    %cst_110 = arith.constant dense<0.000000e+00> : vector<128xf32>
    %155 = vector.multi_reduction <add>, %154, %cst_110 [0] : vector<16x128xf32> to vector<128xf32>
    %156 = vector.shape_cast %155 : vector<128xf32> to vector<1x128xf32>
    %c2_111 = arith.constant 2 : index
    %c0_112 = arith.constant 0 : index
    %157 = vector.load %arg11[%c2_111, %c0_112] : memref<4x128xf32, #tpu.memory_space<vmem>>, vector<1x128xf32>
    tpu.vector_store %arg11[%c2_111, %c0_112], %156 {strides = array<i32>} : memref<4x128xf32, #tpu.memory_space<vmem>>, vector<1x128xf32>,
    %158 = vector.extract_strided_slice %149 {offsets = [16, 0], sizes = [16, 128], strides = [1, 1]} : vector<32x128xf32> to vector<16x128xf32>
    %cst_113 = arith.constant dense<0.000000e+00> : vector<128xf32>
    %159 = vector.multi_reduction <add>, %158, %cst_113 [0] : vector<16x128xf32> to vector<128xf32>
    %160 = vector.shape_cast %159 : vector<128xf32> to vector<1x128xf32>
    %c1_114 = arith.constant 1 : index
    %c0_115 = arith.constant 0 : index
    %161 = vector.load %arg11[%c1_114, %c0_115] : memref<4x128xf32, #tpu.memory_space<vmem>>, vector<1x128xf32>
    tpu.vector_store %arg11[%c1_114, %c0_115], %160 {strides = array<i32>} : memref<4x128xf32, #tpu.memory_space<vmem>>, vector<1x128xf32>,
    %162 = arith.mulf %158, %158 : vector<16x128xf32>
    %cst_116 = arith.constant dense<0.000000e+00> : vector<128xf32>
    %163 = vector.multi_reduction <add>, %162, %cst_116 [0] : vector<16x128xf32> to vector<128xf32>
    %164 = vector.shape_cast %163 : vector<128xf32> to vector<1x128xf32>
    %c3_117 = arith.constant 3 : index
    %c0_118 = arith.constant 0 : index
    %165 = vector.load %arg11[%c3_117, %c0_118] : memref<4x128xf32, #tpu.memory_space<vmem>>, vector<1x128xf32>
    tpu.vector_store %arg11[%c3_117, %c0_118], %164 {strides = array<i32>} : memref<4x128xf32, #tpu.memory_space<vmem>>, vector<1x128xf32>,
    %c0_119 = arith.constant 0 : index
    %c0_120 = arith.constant 0 : index
    %166 = vector.load %arg11[%c0_119, %c0_120] : memref<4x128xf32, #tpu.memory_space<vmem>>, vector<4x128xf32>
    %c0_121 = arith.constant 0 : index
    %c0_122 = arith.constant 0 : index
    %167 = vector.load %arg7[%c0_121, %c0_122] : memref<128x128xf32, #tpu.memory_space<vmem>>, vector<128x128xf32>
    %cst_123 = arith.constant dense<0.000000e+00> : vector<4x128xf32>
    %168 = tpu.matmul %166, %167, %cst_123 {dimension_numbers = #tpu.dot_dimension_numbers<[1], [0], [0], [1], [0, 0, 1, 1], [], []>} : vector<4x128xf32>, vector<128x128xf32>, vector<4x128xf32> -> vector<4x128xf32>
    %c0_124 = arith.constant 0 : index
    %c0_125 = arith.constant 0 : index
    %169 = vector.load %arg12[%c0_124, %c0_125] : memref<4x128xf32, #tpu.memory_space<vmem>>, vector<4x128xf32>
    tpu.vector_store %arg12[%c0_124, %c0_125], %168 {strides = array<i32>} : memref<4x128xf32, #tpu.memory_space<vmem>>, vector<4x128xf32>,
    %c0_126 = arith.constant 0 : index
    %c0_127 = arith.constant 0 : index
    %170 = vector.load %arg10[%c0_126, %c0_127] : memref<4x128xf32, #tpu.memory_space<vmem>>, vector<1x128xf32>
    %cst_128 = arith.constant 6.400000e+01 : f32
    %171 = vector.broadcast %cst_128 : f32 to vector<1x128xf32>
    %172 = arith.divf %170, %171 : vector<1x128xf32>
    %c2_129 = arith.constant 2 : index
    %c0_130 = arith.constant 0 : index
    %173 = vector.load %arg10[%c2_129, %c0_130] : memref<4x128xf32, #tpu.memory_space<vmem>>, vector<1x128xf32>
    %cst_131 = arith.constant 6.400000e+01 : f32
    %174 = vector.broadcast %cst_131 : f32 to vector<1x128xf32>
    %175 = arith.mulf %174, %172 : vector<1x128xf32>
    %176 = arith.mulf %175, %172 : vector<1x128xf32>
    %177 = arith.subf %173, %176 : vector<1x128xf32>
    %cst_132 = arith.constant 6.300000e+01 : f32
    %178 = vector.broadcast %cst_132 : f32 to vector<1x128xf32>
    %179 = arith.divf %177, %178 : vector<1x128xf32>
    %cst_133 = arith.constant 9.99999974E-6 : f32
    %180 = vector.broadcast %cst_133 : f32 to vector<1x128xf32>
    %181 = arith.addf %179, %180 : vector<1x128xf32>
    %182 = math.sqrt %181 : vector<1x128xf32>
    %c0_134 = arith.constant 0 : index
    %c0_135 = arith.constant 0 : index
    %183 = vector.load %arg12[%c0_134, %c0_135] : memref<4x128xf32, #tpu.memory_space<vmem>>, vector<1x128xf32>
    %cst_136 = arith.constant 2.560000e+02 : f32
    %184 = vector.broadcast %cst_136 : f32 to vector<1x128xf32>
    %185 = arith.divf %183, %184 : vector<1x128xf32>
    %c2_137 = arith.constant 2 : index
    %c0_138 = arith.constant 0 : index
    %186 = vector.load %arg12[%c2_137, %c0_138] : memref<4x128xf32, #tpu.memory_space<vmem>>, vector<1x128xf32>
    %cst_139 = arith.constant 2.560000e+02 : f32
    %187 = vector.broadcast %cst_139 : f32 to vector<1x128xf32>
    %188 = arith.mulf %187, %185 : vector<1x128xf32>
    %189 = arith.mulf %188, %185 : vector<1x128xf32>
    %190 = arith.subf %186, %189 : vector<1x128xf32>
    %cst_140 = arith.constant 2.550000e+02 : f32
    %191 = vector.broadcast %cst_140 : f32 to vector<1x128xf32>
    %192 = arith.divf %190, %191 : vector<1x128xf32>
    %cst_141 = arith.constant 9.99999974E-6 : f32
    %193 = vector.broadcast %cst_141 : f32 to vector<1x128xf32>
    %194 = arith.addf %192, %193 : vector<1x128xf32>
    %195 = math.rsqrt %194 : vector<1x128xf32>
    %196 = arith.mulf %182, %195 : vector<1x128xf32>
    %197 = arith.mulf %185, %196 : vector<1x128xf32>
    %198 = arith.subf %172, %197 : vector<1x128xf32>
    %199 = vector.extract_strided_slice %149 {offsets = [0, 0], sizes = [16, 128], strides = [1, 1]} : vector<32x128xf32> to vector<16x128xf32>
    %200 = vector.broadcast %196 : vector<1x128xf32> to vector<16x128xf32>
    %201 = arith.mulf %199, %200 : vector<16x128xf32>
    %202 = vector.broadcast %198 : vector<1x128xf32> to vector<16x128xf32>
    %203 = arith.addf %201, %202 : vector<16x128xf32>
    %cst_142 = arith.constant 0.000000e+00 : f32
    %204 = vector.broadcast %cst_142 : f32 to vector<16x128xf32>
    %205 = arith.maximumf %203, %204 : vector<16x128xf32>
    %c1_143 = arith.constant 1 : index
    %c0_144 = arith.constant 0 : index
    %206 = vector.load %arg10[%c1_143, %c0_144] : memref<4x128xf32, #tpu.memory_space<vmem>>, vector<1x128xf32>
    %cst_145 = arith.constant 6.400000e+01 : f32
    %207 = vector.broadcast %cst_145 : f32 to vector<1x128xf32>
    %208 = arith.divf %206, %207 : vector<1x128xf32>
    %c3_146 = arith.constant 3 : index
    %c0_147 = arith.constant 0 : index
    %209 = vector.load %arg10[%c3_146, %c0_147] : memref<4x128xf32, #tpu.memory_space<vmem>>, vector<1x128xf32>
    %cst_148 = arith.constant 6.400000e+01 : f32
    %210 = vector.broadcast %cst_148 : f32 to vector<1x128xf32>
    %211 = arith.mulf %210, %208 : vector<1x128xf32>
    %212 = arith.mulf %211, %208 : vector<1x128xf32>
    %213 = arith.subf %209, %212 : vector<1x128xf32>
    %cst_149 = arith.constant 6.300000e+01 : f32
    %214 = vector.broadcast %cst_149 : f32 to vector<1x128xf32>
    %215 = arith.divf %213, %214 : vector<1x128xf32>
    %cst_150 = arith.constant 9.99999974E-6 : f32
    %216 = vector.broadcast %cst_150 : f32 to vector<1x128xf32>
    %217 = arith.addf %215, %216 : vector<1x128xf32>
    %218 = math.sqrt %217 : vector<1x128xf32>
    %c1_151 = arith.constant 1 : index
    %c0_152 = arith.constant 0 : index
    %219 = vector.load %arg12[%c1_151, %c0_152] : memref<4x128xf32, #tpu.memory_space<vmem>>, vector<1x128xf32>
    %cst_153 = arith.constant 2.560000e+02 : f32
    %220 = vector.broadcast %cst_153 : f32 to vector<1x128xf32>
    %221 = arith.divf %219, %220 : vector<1x128xf32>
    %c3_154 = arith.constant 3 : index
    %c0_155 = arith.constant 0 : index
    %222 = vector.load %arg12[%c3_154, %c0_155] : memref<4x128xf32, #tpu.memory_space<vmem>>, vector<1x128xf32>
    %cst_156 = arith.constant 2.560000e+02 : f32
    %223 = vector.broadcast %cst_156 : f32 to vector<1x128xf32>
    %224 = arith.mulf %223, %221 : vector<1x128xf32>
    %225 = arith.mulf %224, %221 : vector<1x128xf32>
    %226 = arith.subf %222, %225 : vector<1x128xf32>
    %cst_157 = arith.constant 2.550000e+02 : f32
    %227 = vector.broadcast %cst_157 : f32 to vector<1x128xf32>
    %228 = arith.divf %226, %227 : vector<1x128xf32>
    %cst_158 = arith.constant 9.99999974E-6 : f32
    %229 = vector.broadcast %cst_158 : f32 to vector<1x128xf32>
    %230 = arith.addf %228, %229 : vector<1x128xf32>
    %231 = math.rsqrt %230 : vector<1x128xf32>
    %232 = arith.mulf %218, %231 : vector<1x128xf32>
    %233 = arith.mulf %221, %232 : vector<1x128xf32>
    %234 = arith.subf %208, %233 : vector<1x128xf32>
    %235 = vector.extract_strided_slice %149 {offsets = [16, 0], sizes = [16, 128], strides = [1, 1]} : vector<32x128xf32> to vector<16x128xf32>
    %236 = vector.broadcast %232 : vector<1x128xf32> to vector<16x128xf32>
    %237 = arith.mulf %235, %236 : vector<16x128xf32>
    %238 = vector.broadcast %234 : vector<1x128xf32> to vector<16x128xf32>
    %239 = arith.addf %237, %238 : vector<16x128xf32>
    %cst_159 = arith.constant 0.000000e+00 : f32
    %240 = vector.broadcast %cst_159 : f32 to vector<16x128xf32>
    %241 = arith.maximumf %239, %240 : vector<16x128xf32>
    %242 = tpu.concatenate %205, %241 in 0 : vector<16x128xf32>, vector<16x128xf32> -> vector<32x128xf32>
    %243 = arith.addf %242, %0 : vector<32x128xf32>
    %c0_160 = arith.constant 0 : index
    %c0_161 = arith.constant 0 : index
    %244 = vector.load %arg8[%c0_160, %c0_161] : memref<32x128xf32, #tpu.memory_space<vmem>>, vector<32x128xf32>
    tpu.vector_store %arg8[%c0_160, %c0_161], %243 {strides = array<i32>} : memref<32x128xf32, #tpu.memory_space<vmem>>, vector<32x128xf32>,
    return
  }
  func.func @transform_0(%arg0: i32) -> (i32, i32) {
    %c0_i32 = arith.constant 0 : i32
    %c0_i32_0 = arith.constant 0 : i32
    return %arg0, %c0_i32 : i32, i32
  }
  func.func @transform_1(%arg0: i32) -> (i32, i32, i32) {
    %c0_i32 = arith.constant 0 : i32
    %c0_i32_0 = arith.constant 0 : i32
    %c0_i32_1 = arith.constant 0 : i32
    return %arg0, %c0_i32, %c0_i32_0 : i32, i32, i32
  }
  func.func @transform_2(%arg0: i32) -> (i32, i32, i32) {
    %c0_i32 = arith.constant 0 : i32
    %c0_i32_0 = arith.constant 0 : i32
    %c0_i32_1 = arith.constant 0 : i32
    %c0_i32_2 = arith.constant 0 : i32
    return %c0_i32, %c0_i32_0, %c0_i32_1 : i32, i32, i32
  }
  func.func @transform_3(%arg0: i32) -> (i32, i32, i32) {
    %c0_i32 = arith.constant 0 : i32
    %c0_i32_0 = arith.constant 0 : i32
    %c0_i32_1 = arith.constant 0 : i32
    %c0_i32_2 = arith.constant 0 : i32
    return %c0_i32, %c0_i32_0, %c0_i32_1 : i32, i32, i32
  }
  func.func @transform_4(%arg0: i32) -> (i32, i32, i32) {
    %c0_i32 = arith.constant 0 : i32
    %c0_i32_0 = arith.constant 0 : i32
    %c0_i32_1 = arith.constant 0 : i32
    %c0_i32_2 = arith.constant 0 : i32
    return %c0_i32, %c0_i32_0, %c0_i32_1 : i32, i32, i32
  }
  func.func @transform_5(%arg0: i32) -> (i32, i32) {
    %c0_i32 = arith.constant 0 : i32
    %c0_i32_0 = arith.constant 0 : i32
    %c0_i32_1 = arith.constant 0 : i32
    return %c0_i32, %c0_i32_0 : i32, i32
  }
  func.func @transform_6(%arg0: i32) -> (i32, i32) {
    %c0_i32 = arith.constant 0 : i32
    %c0_i32_0 = arith.constant 0 : i32
    %c0_i32_1 = arith.constant 0 : i32
    return %c0_i32, %c0_i32_0 : i32, i32
  }
  func.func @transform_7(%arg0: i32) -> (i32, i32) {
    %c0_i32 = arith.constant 0 : i32
    %c0_i32_0 = arith.constant 0 : i32
    return %arg0, %c0_i32 : i32, i32
  }
}

</mosaic_0001>

<bundles_post_ra>
// kernel: adain_resblock.1
= control target key start
LH: loop header
LB: loop body
LE: loop exit
PB: predicated region body
PF: predicated region fallthrough
CT: control target
= control target key end

     0   :  { %s2271_s24 = smov 0   ;;  %s3046_s0 = inlined_call_operand.vmem [shape: f32[64,128], index: 0, kind: input, shape index: {}]   ;;  %s3047_s1 = inlined_call_operand.vmem [shape: f32[4,4,128], index: 1, kind: input, shape index: {}]   ;;  %s3048_s2 = inlined_call_operand.vmem [shape: f32[2,32,128], index: 2, kind: input, shape index: {}]   ;;  %s3049_s3 = inlined_call_operand.vmem [shape: f32[3,128,128], index: 3, kind: input, shape index: {}]   ;;  %s3050_s4 = inlined_call_operand.vmem [shape: f32[3,128,128], index: 4, kind: input, shape index: {}]   ;;  %s3051_s5 = inlined_call_operand.vmem [shape: f32[128,128], index: 5, kind: input, shape index: {}, may-alias: {5,6}]   ;;  %s3052_s6 = inlined_call_operand.vmem [shape: f32[128,128], index: 6, kind: input, shape index: {}, may-alias: {5,6}]   ;;  %s3053_s7 = inlined_call_operand.vmem [shape: f32[64,128], index: 7, kind: output, shape index: {}]  }
   0x1 LB: > { %s1605_s25 = sadd.s32 4294967295, %s2227_s24   ;;  %p1609_p0 = scmp.ge.s32.totalorder %s2227_s24, 1  ;;  %s2227_s24 = sphi %s2271_s24, %s17_s24  }
   0x2   : > { %p249_p1 = scmp.lt.s32.totalorder %s2227_s24, 3 }
   0x4   : > { %p250_p2 = pnand %p1609_p0, %p249_p1 }
   0x5   : > { %s1612_s9 = sshll.u32 (!%p250_p2), %s1605_s25, 1  ;;  %s1610_s14 = sshll.u32 (!%p250_p2), %s1605_s25, 2 }
   0x6   : > { %253 = sbr.rel (%p250_p2) target bundleno = 1053 (0x41d), region = 48  ;;  %p293_p3 = scmp.lt.s32.totalorder (!%p250_p2), %s1612_s9, 3 }
   0x7   : > { %p287_p4 = scmp.lt.s32.totalorder (!%p250_p2), %s1610_s14, 7 }
   0xb   : > { %v503_v0 = vld [vmem:[%s3049_s3 + $0x78] sm:$0xff]  ;;  %v502_v2 = vld [vmem:[%s3049_s3 + $0x70] sm:$0xff]  ;;  %v2229_v3 = vmov 0.0   ;;  %v501_v5 = vld [vmem:[%s3049_s3 + $0x68] sm:$0xff]  ;;  %s3055_s9 = smov (!%p293_p3, %s1612_s9), 3  ;;  %vm318_vm0 = vcmask 1043456   ;;  %v447_v33 = vlaneseq }
   0xc   : > { %v371_v1 = vld [vmem:[%s3051_s5 + $0x78] sm:$0xff]  ;;  %1858 = vmatprep.subr.mxu0 %v2229_v3  ;;  %1893 = vmatprep.subr.mxu1 %v503_v0  ;;  %v370_v4 = vld [vmem:[%s3051_s5 + $0x70] sm:$0xff]  ;;  %v369_v6 = vld [vmem:[%s3051_s5 + $0x68] sm:$0xff]  ;;  %s1613_s21 = sshll.u32 %s3055_s9, 2  ;;  %s3057_s14 = smov (!%p287_p4, %s1610_s14), 7  ;;  %vm2230_vm2 = vmmov 0  }
   0xd   : > { %1859 = vmatpush3.msra.mxu0 %v371_v1  ;;  %1894 = vmatpush3.msra.mxu1 %v503_v0  ;;  %v500_v7 = vld [vmem:[%s3049_s3 + $0x60] sm:$0xff]  ;;  %v499_v9 = vld [vmem:[%s3049_s3 + $0x58] sm:$0xff]  ;;  %s296_s29 = scalar_lea.vmem %s3047_s1, %s1613_s21  ;;  %v498_v11 = vld [vmem:[%s3049_s3 + $0x50] sm:$0xff]  ;;  %s1611_s20 = sshll.u32 %s3057_s14, 3  ;;  %v2379_v48 = vshrl.u32 %v447_v33, 7 }
   0xe   : > { %1860 = vmatprep.subr.mxu0 %v2229_v3  ;;  %1895 = vmatprep.subr.mxu1 %v502_v2  ;;  %v368_v8 = vld [vmem:[%s3051_s5 + $0x60] sm:$0xff]  ;;  %v367_v10 = vld [vmem:[%s3051_s5 + $0x58] sm:$0xff]  ;;  %v366_v12 = vld [vmem:[%s3051_s5 + $0x50] sm:$0xff]  ;;  %s2360_s30 = scalar_lea.vmem %s3046_s0, %s1611_s20  ;;  %s302_s17 = scalar_lea.vmem %s3053_s7, %s1611_s20 }
   0xf   : > { %1861 = vmatpush3.msra.mxu0 %v370_v4  ;;  %1896 = vmatpush3.msra.mxu1 %v502_v2  ;;  %v497_v13 = vld [vmem:[%s3049_s3 + $0x48] sm:$0xff]  ;;  %v317_v14 = vld [vmem:[%s296_s29] sm:$0xf]  ;;  %v1620_v18 = vld [vmem:[%s296_s29 + $0x4] sm:$0xf]  ;;  %vm449_vm1 = vcmp.lt.s32.totalorder %v2379_v48, 1 }
  0x10   : > { %1862 = vmatprep.subr.mxu0 %v2229_v3  ;;  %1897 = vmatprep.subr.mxu1 %v501_v5  ;;  %v365_v15 = vld [vmem:[%s3051_s5 + $0x48] sm:$0xff]  ;;  %v319_v16 = vsel %vm318_vm0, %v317_v14, 0.0  ;;  %v327_v17 = vmul.f32 %v317_v14, %v317_v14  ;;  %v496_v19 = vld [vmem:[%s3049_s3 + $0x40] sm:$0xff]  ;;  %v338_v21 = vsel %vm318_vm0, %v1620_v18, 0.0  ;;  %v346_v22 = vmul.f32 %v1620_v18, %v1620_v18  ;;  %v495_v26 = vld [vmem:[%s3049_s3 + $0x38] sm:$0xff] }
  0x11   : > { %1863 = vmatpush3.msra.mxu0 %v369_v6  ;;  %1898 = vmatpush3.msra.mxu1 %v501_v5  ;;  %v320_v20 = vrot.slane %v319_v16, 4  ;;  %v364_v23 = vld [vmem:[%s3051_s5 + $0x40] sm:$0xff]  ;;  %v339_v25 = vrot.slane %v338_v21, 4  ;;  %v363_v30 = vld [vmem:[%s3051_s5 + $0x38] sm:$0xff]  ;;  %v494_v34 = vld [vmem:[%s3049_s3 + $0x30] sm:$0xff]  ;;  %vm462_vm3 = vcmp.lt.s32.totalorder %v2379_v48, 7 }
  0x12   : > { %1864 = vmatprep.subr.mxu0 %v2229_v3  ;;  %1899 = vmatprep.subr.mxu1 %v500_v7  ;;  %v328_v24 = vsel %vm318_vm0, %v327_v17, 0.0  ;;  %v347_v29 = vsel %vm318_vm0, %v346_v22, 0.0  ;;  %v362_v37 = vld [vmem:[%s3051_s5 + $0x30] sm:$0xff]  ;;  %v493_v40 = vld [vmem:[%s3049_s3 + $0x28] sm:$0xff]  ;;  %v2374_v46 = vld [vmem:[%s2360_s30] sm:$0xff] }
  0x13   : > { %1865 = vmatpush3.msra.mxu0 %v368_v8  ;;  %1900 = vmatpush3.msra.mxu1 %v500_v7  ;;  %v321_v27 = vadd.f32 %v320_v20, %v319_v16  ;;  %v329_v28 = vrot.slane %v328_v24, 4  ;;  %v340_v31 = vadd.f32 %v339_v25, %v338_v21  ;;  %v348_v32 = vrot.slane %v347_v29, 4  ;;  %v361_v43 = vld [vmem:[%s3051_s5 + $0x28] sm:$0xff]  ;;  %v2377_v47 = vld [vmem:[%s2360_s30 + $0x18] sm:$0xff]  ;;  %v492_v49 = vld [vmem:[%s3049_s3 + $0x20] sm:$0xff] }
  0x14   : > { %1866 = vmatprep.subr.mxu0 %v2229_v3  ;;  %1901 = vmatprep.subr.mxu1 %v499_v9  ;;  %v360_v52 = vld [vmem:[%s3051_s5 + $0x20] sm:$0xff]  ;;  %v2389_v55 = vld [vmem:[%s2360_s30 + $0x8] sm:$0xff]  ;;  %v491_v56 = vld [vmem:[%s3049_s3 + $0x18] sm:$0xff]  ;;  %v443_v59 = vrot.slane %v2374_v46, 7  ;;  %v446_v60 = vrot.slane %v2377_v47, 7 }
  0x15   : > { %1867 = vmatpush3.msra.mxu0 %v367_v10  ;;  %1902 = vmatpush3.msra.mxu1 %v499_v9  ;;  %v322_v35 = vrot.slane %v321_v27, 2  ;;  %v330_v36 = vadd.f32 %v329_v28, %v328_v24  ;;  %v341_v38 = vrot.slane %v340_v31, 2  ;;  %v349_v39 = vadd.f32 %v348_v32, %v347_v29  ;;  %v359_v61 = vld [vmem:[%s3051_s5 + $0x18] sm:$0xff]  ;;  %v490_v0 = vld [vmem:[%s3049_s3 + $0x10] sm:$0xff]  ;;  %v489_v6 = vld [vmem:[%s3049_s3 + $0x8] sm:$0xff] }
  0x16   : > { %1868 = vmatprep.subr.mxu0 %v2229_v3  ;;  %1903 = vmatprep.subr.mxu1 %v498_v11  ;;  %v444_v2 = vrot.slane %v2389_v55, 7  ;;  %v358_v4 = vld [vmem:[%s3051_s5 + $0x10] sm:$0xff]  ;;  %v2415_v7 = vld [vmem:[%s3048_s2] sm:$0xff]  ;;  %v453_v8 = vsel %vm449_vm1, %v446_v60, %v443_v59  ;;  %v357_v9 = vld [vmem:[%s3051_s5 + $0x8] sm:$0xff] }
  0x17   : > { %1869 = vmatpush3.msra.mxu0 %v366_v12  ;;  %1904 = vmatpush3.msra.mxu1 %v498_v11  ;;  %v323_v41 = vadd.f32 %v322_v35, %v321_v27  ;;  %v331_v42 = vrot.slane %v330_v36, 2  ;;  %v342_v44 = vadd.f32 %v341_v38, %v340_v31  ;;  %v350_v45 = vrot.slane %v349_v39, 2  ;;  %v488_v10 = vld [vmem:[%s3049_s3] sm:$0xff]  ;;  %v2431_v11 = vld [vmem:[%s3048_s2 + $0x8] sm:$0xff]  ;;  %v1652_v16 = vld [vmem:[%s3049_s3 + $0x178] sm:$0xff] }
  0x18   : > { %1870 = vmatprep.subr.mxu0 %v2229_v3  ;;  %1905 = vmatprep.subr.mxu1 %v497_v13  ;;  %v452_v12 = vsel %vm449_vm1, %v443_v59, %v444_v2  ;;  %v454_v14 = vmul.f32 %v453_v8, %v2415_v7  ;;  %v1651_v20 = vld [vmem:[%s3049_s3 + $0x170] sm:$0xff]  ;;  %v1634_v21 = vld [vmem:[%s3049_s3 + $0xe8] sm:$0xff]  ;;  %v1649_v24 = vld [vmem:[%s3049_s3 + $0x160] sm:$0xff]  ;;  %v461_v59 = vrot.slane %v2377_v47, 1 }
  0x19   : > { %1871 = vmatpush3.msra.mxu0 %v365_v15  ;;  %1906 = vmatpush3.msra.mxu1 %v497_v13  ;;  %v324_v50 = vrot.slane %v323_v41, 1  ;;  %v332_v51 = vadd.f32 %v331_v42, %v330_v36  ;;  %v343_v53 = vrot.slane %v342_v44, 1  ;;  %v351_v54 = vadd.f32 %v350_v45, %v349_v39  ;;  %v356_v13 = vld [vmem:[%s3051_s5] sm:$0xff]  ;;  %v1636_v15 = vld [vmem:[%s3049_s3 + $0xf8] sm:$0xff]  ;;  %v1650_v22 = vld [vmem:[%s3049_s3 + $0x168] sm:$0xff] }
  0x1a   : > { %1872 = vmatprep.subr.mxu0 %v2229_v3  ;;  %1907 = vmatprep.subr.mxu1 %v496_v19  ;;  %v455_v17 = vmul.f32 %v452_v12, %v2431_v11  ;;  %v1632_v25 = vld [vmem:[%s3049_s3 + $0xd8] sm:$0xff]  ;;  %v1631_v27 = vld [vmem:[%s3049_s3 + $0xd0] sm:$0xff]  ;;  %v1630_v29 = vld [vmem:[%s3049_s3 + $0xc8] sm:$0xff] }
  0x1b   : > { %1873 = vmatpush3.msra.mxu0 %v364_v23  ;;  %1908 = vmatpush3.msra.mxu1 %v496_v19  ;;  %v325_v57 = vadd.f32 %v324_v50, %v323_v41  ;;  %v333_v58 = vrot.slane %v332_v51, 1  ;;  %v344_v62 = vadd.f32 %v343_v53, %v342_v44  ;;  %v352_v63 = vrot.slane %v351_v54, 1  ;;  %v1635_v19 = vld [vmem:[%s3049_s3 + $0xf0] sm:$0xff]  ;;  %v1633_v23 = vld [vmem:[%s3049_s3 + $0xe0] sm:$0xff]  ;;  %v1628_v33 = vld [vmem:[%s3049_s3 + $0xb8] sm:$0xff] }
  0x1c   : > { %1874 = vmatprep.subr.mxu0 %v2229_v3  ;;  %1909 = vmatprep.subr.mxu1 %v495_v26  ;;  %v1647_v28 = vld [vmem:[%s3049_s3 + $0x150] sm:$0xff]  ;;  %v1629_v31 = vld [vmem:[%s3049_s3 + $0xc0] sm:$0xff]  ;;  %v1626_v39 = vld [vmem:[%s3049_s3 + $0xa8] sm:$0xff]  ;;  %v459_v53 = vrot.slane %v2389_v55, 1 }
  0x1d   : > { %1875 = vmatpush3.msra.mxu0 %v363_v30  ;;  %1910 = vmatpush3.msra.mxu1 %v495_v26  ;;  %326 = vst [vmem:[#allocation2] sm:$0x1] %v325_v57  ;;  %v334_v1 = vadd.f32 %v333_v58, %v332_v51  ;;  %345 = vst [vmem:[#allocation2 + $0x1] sm:$0x1] %v344_v62  ;;  %v353_v5 = vadd.f32 %v352_v63, %v351_v54  ;;  %v1648_v26 = vld [vmem:[%s3049_s3 + $0x158] sm:$0xff]  ;;  %v1646_v30 = vld [vmem:[%s3049_s3 + $0x148] sm:$0xff] }
  0x1e   : > { %1876 = vmatprep.subr.mxu0 %v2229_v3  ;;  %1911 = vmatprep.subr.mxu1 %v494_v34  ;;  %v1645_v32 = vld [vmem:[%s3049_s3 + $0x140] sm:$0xff]  ;;  %v2501_v35 = vld [vmem:[%s2360_s30 + $0x10] sm:$0xff]  ;;  %v1624_v45 = vld [vmem:[%s3049_s3 + $0x98] sm:$0xff] }
  0x1f   : > { %1877 = vmatpush3.msra.mxu0 %v362_v37  ;;  %1912 = vmatpush3.msra.mxu1 %v494_v34  ;;  %335 = vst [vmem:[#allocation2 + $0x2] sm:$0x1] %v334_v1  ;;  %354 = vst [vmem:[#allocation2 + $0x3] sm:$0x1] %v353_v5  ;;  %v1644_v34 = vld [vmem:[%s3049_s3 + $0x138] sm:$0xff]  ;;  %v1627_v36 = vld [vmem:[%s3049_s3 + $0xb0] sm:$0xff] }
  0x20   : > { %1878 = vmatprep.subr.mxu0 %v2229_v3  ;;  %1913 = vmatprep.subr.mxu1 %v493_v40  ;;  %v1643_v37 = vld [vmem:[%s3049_s3 + $0x130] sm:$0xff]  ;;  %v445_v38 = vrot.slane %v2501_v35, 7  ;;  %v1625_v41 = vld [vmem:[%s3049_s3 + $0xa0] sm:$0xff]  ;;  %v2540_v50 = vld [vmem:[%s3048_s2 + $0x18] sm:$0xff]  ;;  %v460_v58 = vrot.slane %v2501_v35, 1 }
  0x21   : > { %1879 = vmatpush3.msra.mxu0 %v361_v43  ;;  %1914 = vmatpush3.msra.mxu1 %v493_v40  ;;  %v1642_v40 = vld [vmem:[%s3049_s3 + $0x128] sm:$0xff]  ;;  %v1641_v42 = vld [vmem:[%s3049_s3 + $0x120] sm:$0xff]  ;;  %v2525_v43 = vld [vmem:[%s3048_s2 + $0x10] sm:$0xff] }
  0x22   : > { %1880 = vmatprep.subr.mxu0 %v2229_v3  ;;  %1915 = vmatprep.subr.mxu1 %v492_v49  ;;  %v451_v44 = vsel %vm449_vm1, %v444_v2, %v445_v38  ;;  %v450_v51 = vsel %vm449_vm1, %v445_v38, %v446_v60  ;;  %v1623_v54 = vld [vmem:[%s3049_s3 + $0x90] sm:$0xff]  ;;  %v1638_v62 = vld [vmem:[%s3049_s3 + $0x108] sm:$0xff]  ;;  %v2568_v63 = vld [vmem:[%s3048_s2 + $0x20] sm:$0xff]  ;;  %v464_v2 = vsel %vm462_vm3, %v459_v53, %v460_v58 }
  0x23   : > { %1881 = vmatpush3.msra.mxu0 %v360_v52  ;;  %1916 = vmatpush3.msra.mxu1 %v492_v49  ;;  %v1640_v49 = vld [vmem:[%s3049_s3 + $0x118] sm:$0xff]  ;;  %v458_v52 = vrot.slane %v2374_v46, 1  ;;  %v456_v57 = vmul.f32 %v451_v44, %v2525_v43  ;;  %v457_v60 = vmul.f32 %v450_v51, %v2540_v50  ;;  %v2575_v1 = vld [vmem:[%s3048_s2 + $0x28] sm:$0xff]  ;;  %v1637_v5 = vld [vmem:[%s3049_s3 + $0x100] sm:$0xff]  ;;  %v463_v8 = vsel %vm462_vm3, %v460_v58, %v461_v59 }
  0x24   : > { %1882 = vmatprep.subr.mxu0 %v2229_v3  ;;  %1917 = vmatprep.subr.mxu1 %v491_v56 }
  0x25   : > { %1883 = vmatpush3.msra.mxu0 %v359_v61  ;;  %1918 = vmatpush3.msra.mxu1 %v491_v56  ;;  %v1639_v56 = vld [vmem:[%s3049_s3 + $0x110] sm:$0xff]  ;;  %v1622_v61 = vld [vmem:[%s3049_s3 + $0x88] sm:$0xff] }
  0x26   : > { %1884 = vmatprep.subr.mxu0 %v2229_v3  ;;  %1919 = vmatprep.subr.mxu1 %v490_v0  ;;  %v355_v18 = vld [vmem:[#allocation2] sm:$0xf] }
  0x27   : > { %1885 = vmatpush3.msra.mxu0 %v358_v4  ;;  %1920 = vmatpush3.msra.mxu1 %v490_v0  ;;  %v465_v0 = vsel %vm462_vm3, %v458_v52, %v459_v53  ;;  %v1621_v4 = vld [vmem:[%s3049_s3 + $0x80] sm:$0xff] }
  0x28   : > { %1886 = vmatprep.subr.mxu0 %v2229_v3  ;;  %1921 = vmatprep.subr.mxu1 %v489_v6 }
  0x29   : > { %1887 = vmatpush3.msra.mxu0 %v357_v9  ;;  %1922 = vmatpush3.msra.mxu1 %v489_v6  ;;  %v2588_v6 = vld [vmem:[%s3048_s2 + $0x30] sm:$0xff]  ;;  %v467_v9 = vmul.f32 %v2568_v63, %v465_v0 }
  0x2a   : > { %1888 = vmatprep.subr.mxu0 %v2229_v3  ;;  %1923 = vmatprep.subr.mxu1 %v488_v10  ;;  %v469_v12 = vmul.f32 %v2588_v6, %v463_v8 }
  0x2b   : > { %1889 = vmatpush3.msra.mxu0 %v356_v13  ;;  %1890 = vmatprep.mubr.msk.f32.mxu0 %vm2230_vm2, %v2229_v3  ;;  %v2598_v13 = vld [vmem:[%s3048_s2 + $0x38] sm:$0xff] }
  0x2c   : > { %1924 = vmatpush3.msra.mxu1 %v488_v10  ;;  %1925 = vmatprep.mubr.f32.mxu1 %v454_v14  ;;  %v468_v10 = vmul.f32 %v2575_v1, %v464_v2  ;;  %v466_v14 = vsel %vm462_vm3, %v461_v59, %v458_v52 }
  0x2d   : > { %1931 = vmatprep.subr.mxu0 %v1636_v15  ;;  %1969 = vmatprep.subr.mxu1 %v1652_v16 }
  0x2e   : > { %1891 = vmatmul.mubr.f32.vlgmr.msra.gmra.mxu0 %v355_v18  ;;  %1926 = vmatmul.mubr.f32.vlgmr.msra.gmra.mxu1 %v455_v17  ;;  %v2641_v17 = vld [vmem:[%s3052_s6 + $0x58] sm:$0xff]  ;;  %v2648_v18 = vld [vmem:[%s3052_s6 + $0x50] sm:$0xff] }
  0x2f   : > { %1932 = vmatpush3.msra.mxu0 %v1636_v15  ;;  %1970 = vmatpush3.msra.mxu1 %v1652_v16  ;;  %v470_v15 = vmul.f32 %v2598_v13, %v466_v14  ;;  %v2634_v16 = vld [vmem:[%s3052_s6 + $0x60] sm:$0xff] }
  0x30   : > { %1933 = vmatprep.subr.mxu0 %v1635_v19  ;;  %1971 = vmatprep.subr.mxu1 %v1651_v20 }
  0x31   : > { %1934 = vmatpush3.msra.mxu0 %v1635_v19  ;;  %1972 = vmatpush3.msra.mxu1 %v1651_v20  ;;  %v2655_v19 = vld [vmem:[%s3052_s6 + $0x48] sm:$0xff]  ;;  %v2662_v20 = vld [vmem:[%s3052_s6 + $0x40] sm:$0xff] }
  0x32   : > { %1935 = vmatprep.subr.mxu0 %v1634_v21  ;;  %1973 = vmatprep.subr.mxu1 %v1650_v22 }
  0x33   : > { %1936 = vmatpush3.msra.mxu0 %v1634_v21  ;;  %1974 = vmatpush3.msra.mxu1 %v1650_v22  ;;  %v2669_v21 = vld [vmem:[%s3052_s6 + $0x38] sm:$0xff]  ;;  %v2676_v22 = vld [vmem:[%s3052_s6 + $0x30] sm:$0xff] }
  0x34   : > { %1937 = vmatprep.subr.mxu0 %v1633_v23  ;;  %1975 = vmatprep.subr.mxu1 %v1649_v24 }
  0x35   : > { %1938 = vmatpush3.msra.mxu0 %v1633_v23  ;;  %1976 = vmatpush3.msra.mxu1 %v1649_v24  ;;  %v2683_v23 = vld [vmem:[%s3052_s6 + $0x28] sm:$0xff]  ;;  %v2690_v24 = vld [vmem:[%s3052_s6 + $0x20] sm:$0xff] }
  0x36   : > { %1939 = vmatprep.subr.mxu0 %v1632_v25  ;;  %1977 = vmatprep.subr.mxu1 %v1648_v26 }
  0x37   : > { %1940 = vmatpush3.msra.mxu0 %v1632_v25  ;;  %1978 = vmatpush3.msra.mxu1 %v1648_v26  ;;  %v2697_v25 = vld [vmem:[%s3052_s6 + $0x18] sm:$0xff]  ;;  %v2702_v26 = vld [vmem:[%s3052_s6 + $0x10] sm:$0xff] }
  0x38   : > { %1941 = vmatprep.subr.mxu0 %v1631_v27  ;;  %1979 = vmatprep.subr.mxu1 %v1647_v28 }
  0x39   : > { %1942 = vmatpush3.msra.mxu0 %v1631_v27  ;;  %1980 = vmatpush3.msra.mxu1 %v1647_v28  ;;  %v2709_v27 = vld [vmem:[%s3052_s6 + $0x8] sm:$0xff]  ;;  %v2716_v28 = vld [vmem:[%s3052_s6] sm:$0xff] }
  0x3a   : > { %1943 = vmatprep.subr.mxu0 %v1630_v29  ;;  %1981 = vmatprep.subr.mxu1 %v1646_v30 }
  0x3b   : > { %1944 = vmatpush3.msra.mxu0 %v1630_v29  ;;  %1982 = vmatpush3.msra.mxu1 %v1646_v30 }
  0x3c   : > { %1945 = vmatprep.subr.mxu0 %v1629_v31  ;;  %1983 = vmatprep.subr.mxu1 %v1645_v32 }
  0x3d   : > { %1946 = vmatpush3.msra.mxu0 %v1629_v31  ;;  %1984 = vmatpush3.msra.mxu1 %v1645_v32 }
  0x3e   : > { %1947 = vmatprep.subr.mxu0 %v1628_v33  ;;  %1985 = vmatprep.subr.mxu1 %v1644_v34 }
  0x3f   : > { %1948 = vmatpush3.msra.mxu0 %v1628_v33  ;;  %1986 = vmatpush3.msra.mxu1 %v1644_v34 }
  0x40   : > { %1949 = vmatprep.subr.mxu0 %v1627_v36  ;;  %1987 = vmatprep.subr.mxu1 %v1643_v37 }
  0x41   : > { %1950 = vmatpush3.msra.mxu0 %v1627_v36  ;;  %1988 = vmatpush3.msra.mxu1 %v1643_v37 }
  0x42   : > { %1951 = vmatprep.subr.mxu0 %v1626_v39  ;;  %1989 = vmatprep.subr.mxu1 %v1642_v40 }
  0x43   : > { %1952 = vmatpush3.msra.mxu0 %v1626_v39  ;;  %1990 = vmatpush3.msra.mxu1 %v1642_v40 }
  0x44   : > { %1953 = vmatprep.subr.mxu0 %v1625_v41  ;;  %1991 = vmatprep.subr.mxu1 %v1641_v42 }
  0x45   : > { %1954 = vmatpush3.msra.mxu0 %v1625_v41  ;;  %1992 = vmatpush3.msra.mxu1 %v1641_v42 }
  0x46   : > { %1955 = vmatprep.subr.mxu0 %v1624_v45  ;;  %1993 = vmatprep.subr.mxu1 %v1640_v49 }
  0x47   : > { %1956 = vmatpush3.msra.mxu0 %v1624_v45  ;;  %1994 = vmatpush3.msra.mxu1 %v1640_v49 }
  0x48   : > { %1957 = vmatprep.subr.mxu0 %v1623_v54  ;;  %1995 = vmatprep.subr.mxu1 %v1639_v56 }
  0x49   : > { %1928 = vmatprep.mubr.f32.mxu1 %v456_v57  ;;  %1958 = vmatpush3.msra.mxu0 %v1623_v54 }
  0x4a   : > { %1996 = vmatpush3.msra.mxu1 %v1639_v56  ;;  %1959 = vmatprep.subr.mxu0 %v1622_v61 }
  0x4b   : > { %1929 = vmatmul.mubr.f32.gmra.mxu1 %v457_v60  ;;  %1997 = vmatprep.subr.mxu1 %v1638_v62 }
  0x4c   : > { %1960 = vmatpush3.msra.mxu0 %v1622_v61  ;;  %1998 = vmatpush3.msra.mxu1 %v1638_v62 }
  0x4d   : > { %1961 = vmatprep.subr.mxu0 %v1621_v4  ;;  %1999 = vmatprep.subr.mxu1 %v1637_v5 }
  0x4e   : > { %1962 = vmatpush3.msra.mxu0 %v1621_v4  ;;  %1963 = vmatprep.mubr.f32.mxu0 %v2374_v46  ;;  %v2613_v46 = vld [vmem:[%s3052_s6 + $0x78] sm:$0xff] }
  0x4f   : > { %2000 = vmatpush3.msra.mxu1 %v1637_v5  ;;  %2001 = vmatprep.mubr.f32.mxu1 %v467_v9 }
  0x50   : > { %1964 = vmatmul.mubr.f32.vlgmr.msra.gmra.mxu0 %v2389_v55  ;;  %2002 = vmatmul.mubr.f32.vlgmr.msra.gmra.mxu1 %v468_v10  ;;  %v2620_v55 = vld [vmem:[%s3052_s6 + $0x70] sm:$0xff] }
  0x51   : > { %1966 = vmatprep.mubr.f32.mxu0 %v2501_v35  ;;  %2004 = vmatprep.mubr.f32.mxu1 %v469_v12 }
  0x52   : > { %2007 = vmatprep.subr.mxu0 %v2229_v3 }
  0x53   : > { %2008 = vmatpush3.msra.mxu0 %v2613_v46 }
  0x54   : > { %1967 = vmatmul.mubr.f32.gmra.mxu0 %v2377_v47  ;;  %2005 = vmatmul.mubr.f32.gmra.mxu1 %v470_v15  ;;  %v2627_v47 = vld [vmem:[%s3052_s6 + $0x68] sm:$0xff] }
  0x55   : > { %2039 = vmatprep.mubr.msk.f32.mxu0 %vm2230_vm2, %v2229_v3  ;;  %2009 = vmatprep.subr.mxu0 %v2229_v3 }
  0x56   : > { %2010 = vmatpush3.msra.mxu0 %v2620_v55 }
  0x57   : > { %2011 = vmatprep.subr.mxu0 %v2229_v3 }
  0x58   : > { %2012 = vmatpush3.msra.mxu0 %v2627_v47 }
  0x59   : > { %2013 = vmatprep.subr.mxu0 %v2229_v3 }
  0x5a   : > { %2014 = vmatpush3.msra.mxu0 %v2634_v16 }
  0x5b   : > { %2015 = vmatprep.subr.mxu0 %v2229_v3 }
  0x5c   : > { %2016 = vmatpush3.msra.mxu0 %v2641_v17 }
  0x5d   : > { %2017 = vmatprep.subr.mxu0 %v2229_v3 }
  0x5e   : > { %2018 = vmatpush3.msra.mxu0 %v2648_v18 }
  0x5f   : > { %2019 = vmatprep.subr.mxu0 %v2229_v3 }
  0x60   : > { %2020 = vmatpush3.msra.mxu0 %v2655_v19 }
  0x61   : > { %2021 = vmatprep.subr.mxu0 %v2229_v3 }
  0x62   : > { %2022 = vmatpush3.msra.mxu0 %v2662_v20 }
  0x63   : > { %2023 = vmatprep.subr.mxu0 %v2229_v3 }
  0x64   : > { %2024 = vmatpush3.msra.mxu0 %v2669_v21 }
  0x65   : > { %2025 = vmatprep.subr.mxu0 %v2229_v3 }
  0x66   : > { %2026 = vmatpush3.msra.mxu0 %v2676_v22 }
  0x67   : > { %2027 = vmatprep.subr.mxu0 %v2229_v3 }
  0x68   : > { %2028 = vmatpush3.msra.mxu0 %v2683_v23 }
  0x69   : > { %2029 = vmatprep.subr.mxu0 %v2229_v3 }
  0x6a   : > { %2030 = vmatpush3.msra.mxu0 %v2690_v24 }
  0x6b   : > { %2031 = vmatprep.subr.mxu0 %v2229_v3 }
  0x6c   : > { %2032 = vmatpush3.msra.mxu0 %v2697_v25 }
  0x6d   : > { %2033 = vmatprep.subr.mxu0 %v2229_v3 }
  0x6e   : > { %2034 = vmatpush3.msra.mxu0 %v2702_v26 }
  0x6f   : > { %2035 = vmatprep.subr.mxu0 %v2229_v3 }
  0x70   : > { %2036 = vmatpush3.msra.mxu0 %v2709_v27 }
  0x71   : > { %2037 = vmatprep.subr.mxu0 %v2229_v3 }
  0x72   : > { %2038 = vmatpush3.msra.mxu0 %v2716_v28 }
  0xee   : > { %v438_v29 = vpop.f32.mrf.mxu0  ;;  %v1927_v31 = vpop.f32.mrf.mxu1 }
  0xef   : > { %442 = vst [vmem:[#allocation3] sm:$0xf] %v438_v29 }
  0xf0   : > { %v1892_v30 = vpop.f32.mrf.mxu0  ;;  %v570_v32 = vpop.f32.mrf.mxu1 }
 0x10b   : > { %v1930_v33 = vpop.f32.mrf.mxu1 }
 0x10d   : > { %v580_v34 = vpop.f32.mrf.mxu1 }
 0x110   : > { %v1965_v35 = vpop.f32.mrf.mxu0  ;;  %v2003_v36 = vpop.f32.mrf.mxu1 }
 0x111   : > { %v661_v37 = vadd.f32 %v1965_v35, %v1927_v31 }
 0x112   : > { %v655_v38 = vpop.f32.mrf.mxu0  ;;  %v757_v39 = vpop.f32.mrf.mxu1 }
 0x113   : > { %v2721_v40 = vadd.f32 %v2003_v36, %v661_v37  ;;  %v656_v41 = vadd.f32 %v655_v38, %v570_v32 }
 0x114   : > { %v1968_v42 = vpop.f32.mrf.mxu0  ;;  %v2006_v44 = vpop.f32.mrf.mxu1 }
 0x115   : > { %v2723_v45 = vadd.f32 %v757_v39, %v656_v41  ;;  %v671_v49 = vadd.f32 %v1968_v42, %v1930_v33  ;;  %v789_v51 = vmul.f32 %v2721_v40, %v2721_v40 }
 0x116   : > { %v665_v52 = vpop.f32.mrf.mxu0  ;;  %v767_v58 = vpop.f32.mrf.mxu1 }
 0x117   : > { %v780_v53 = vadd.f32 %v2721_v40, %v2723_v45  ;;  %v788_v54 = vmul.f32 %v2723_v45, %v2723_v45  ;;  %v2731_v56 = vadd.f32 %v2006_v44, %v671_v49  ;;  %v666_v57 = vadd.f32 %v665_v52, %v580_v34 }
 0x119   : > { %v781_v59 = vrot.slane %v780_v53, 4  ;;  %v790_v60 = vadd.f32 %v789_v51, %v788_v54  ;;  %v2733_v61 = vadd.f32 %v767_v58, %v666_v57  ;;  %v807_v62 = vmul.f32 %v2731_v56, %v2731_v56  ;;  %v1667_v54 = vld [vmem:[%s3050_s4 + $0xf0] sm:$0xff]  ;;  %v1046_v57 = vld [vmem:[%s3050_s4 + $0x78] sm:$0xff] }
 0x11a   : > { %2042 = vmatprep.subr.mxu1 %v1046_v57  ;;  %v1045_v58 = vld [vmem:[%s3050_s4 + $0x70] sm:$0xff] }
 0x11b   : > { %v782_v0 = vadd.f32 %v781_v59, %v780_v53  ;;  %v791_v2 = vrot.slane %v790_v60, 4  ;;  %v798_v4 = vadd.f32 %v2731_v56, %v2733_v61  ;;  %v806_v5 = vmul.f32 %v2733_v61, %v2733_v61  ;;  %v1668_v53 = vld [vmem:[%s3050_s4 + $0xf8] sm:$0xff]  ;;  %v1666_v59 = vld [vmem:[%s3050_s4 + $0xe8] sm:$0xff]  ;;  %2043 = vmatpush3.msra.mxu1 %v1046_v57 }
 0x11c   : > { %2080 = vmatprep.subr.mxu0 %v1668_v53  ;;  %2044 = vmatprep.subr.mxu1 %v1045_v58 }
 0x11d   : > { %v783_v8 = vrot.slane %v782_v0, 2  ;;  %v792_v9 = vadd.f32 %v791_v2, %v790_v60  ;;  %v799_v10 = vrot.slane %v798_v4, 4  ;;  %v808_v12 = vadd.f32 %v807_v62, %v806_v5  ;;  %v1044_v60 = vld [vmem:[%s3050_s4 + $0x68] sm:$0xff]  ;;  %v1665_v62 = vld [vmem:[%s3050_s4 + $0xe0] sm:$0xff]  ;;  %2045 = vmatpush3.msra.mxu1 %v1045_v58  ;;  %v1664_v2 = vld [vmem:[%s3050_s4 + $0xd8] sm:$0xff] }
 0x11e   : > { %2046 = vmatprep.subr.mxu1 %v1044_v60  ;;  %v1663_v5 = vld [vmem:[%s3050_s4 + $0xd0] sm:$0xff] }
 0x11f   : > { %v784_v14 = vadd.f32 %v783_v8, %v782_v0  ;;  %v793_v15 = vrot.slane %v792_v9, 2  ;;  %v800_v29 = vadd.f32 %v799_v10, %v798_v4  ;;  %v809_v30 = vrot.slane %v808_v12, 4  ;;  %v1043_v0 = vld [vmem:[%s3050_s4 + $0x60] sm:$0xff]  ;;  %2047 = vmatpush3.msra.mxu1 %v1044_v60  ;;  %v1042_v4 = vld [vmem:[%s3050_s4 + $0x58] sm:$0xff]  ;;  %v1041_v8 = vld [vmem:[%s3050_s4 + $0x50] sm:$0xff] }
 0x120   : > { %2048 = vmatprep.subr.mxu1 %v1043_v0  ;;  %v1040_v10 = vld [vmem:[%s3050_s4 + $0x48] sm:$0xff] }
 0x121   : > { %v785_v31 = vrot.slane %v784_v14, 1  ;;  %v794_v32 = vadd.f32 %v793_v15, %v792_v9  ;;  %v801_v33 = vrot.slane %v800_v29, 2  ;;  %v810_v34 = vadd.f32 %v809_v30, %v808_v12  ;;  %2049 = vmatpush3.msra.mxu1 %v1043_v0  ;;  %v1662_v9 = vld [vmem:[%s3050_s4 + $0xc8] sm:$0xff]  ;;  %v1661_v12 = vld [vmem:[%s3050_s4 + $0xc0] sm:$0xff]  ;;  %v1660_v15 = vld [vmem:[%s3050_s4 + $0xb8] sm:$0xff] }
 0x122   : > { %2050 = vmatprep.subr.mxu1 %v1042_v4  ;;  %v1659_v30 = vld [vmem:[%s3050_s4 + $0xb0] sm:$0xff]  ;;  %v907_v0 = vld [vmem:[#allocation3 + $0x2] sm:$0x1] }
 0x123   : > { %v786_v35 = vadd.f32 %v785_v31, %v784_v14  ;;  %v795_v36 = vrot.slane %v794_v32, 1  ;;  %v802_v37 = vadd.f32 %v801_v33, %v800_v29  ;;  %v811_v38 = vrot.slane %v810_v34, 2  ;;  %2051 = vmatpush3.msra.mxu1 %v1042_v4  ;;  %v1039_v14 = vld [vmem:[%s3050_s4 + $0x40] sm:$0xff]  ;;  %v1038_v29 = vld [vmem:[%s3050_s4 + $0x38] sm:$0xff]  ;;  %v1037_v31 = vld [vmem:[%s3050_s4 + $0x30] sm:$0xff] }
 0x124   : > { %2052 = vmatprep.subr.mxu1 %v1041_v8  ;;  %v1036_v33 = vld [vmem:[%s3050_s4 + $0x28] sm:$0xff]  ;;  %v951_v4 = vld [vmem:[#allocation3 + $0x3] sm:$0x1] }
 0x125   : > { %787 = vst [vmem:[#allocation4] sm:$0x1] %v786_v35  ;;  %v796_v39 = vadd.f32 %v795_v36, %v794_v32  ;;  %v803_v41 = vrot.slane %v802_v37, 1  ;;  %v812_v42 = vadd.f32 %v811_v38, %v810_v34  ;;  %2053 = vmatpush3.msra.mxu1 %v1041_v8  ;;  %v1658_v32 = vld [vmem:[%s3050_s4 + $0xa8] sm:$0xff]  ;;  %v1657_v34 = vld [vmem:[%s3050_s4 + $0xa0] sm:$0xff]  ;;  %v1656_v36 = vld [vmem:[%s3050_s4 + $0x98] sm:$0xff] }
 0x126   : > { %2054 = vmatprep.subr.mxu1 %v1040_v10  ;;  %v1035_v35 = vld [vmem:[%s3050_s4 + $0x20] sm:$0xff]  ;;  %v1655_v38 = vld [vmem:[%s3050_s4 + $0x90] sm:$0xff] }
 0x127   : > { %797 = vst [vmem:[#allocation4 + $0x2] sm:$0x1] %v796_v39  ;;  %v804_v44 = vadd.f32 %v803_v41, %v802_v37  ;;  %v813_v49 = vrot.slane %v812_v42, 1  ;;  %2055 = vmatpush3.msra.mxu1 %v1040_v10  ;;  %v1034_v37 = vld [vmem:[%s3050_s4 + $0x18] sm:$0xff]  ;;  %v1033_v39 = vld [vmem:[%s3050_s4 + $0x10] sm:$0xff]  ;;  %v1654_v41 = vld [vmem:[%s3050_s4 + $0x88] sm:$0xff] }
 0x128   : > { %2056 = vmatprep.subr.mxu1 %v1039_v14 }
 0x129   : > { %805 = vst [vmem:[#allocation4 + $0x1] sm:$0x1] %v804_v44  ;;  %v814_v51 = vadd.f32 %v813_v49, %v812_v42  ;;  %2057 = vmatpush3.msra.mxu1 %v1039_v14  ;;  %v1653_v42 = vld [vmem:[%s3050_s4 + $0x80] sm:$0xff]  ;;  %v1032_v44 = vld [vmem:[%s3050_s4 + $0x8] sm:$0xff] }
 0x12a   : > { %2058 = vmatprep.subr.mxu1 %v1038_v29  ;;  %v1031_v49 = vld [vmem:[%s3050_s4] sm:$0xff] }
 0x12b   : > { %815 = vst [vmem:[#allocation4 + $0x3] sm:$0x1] %v814_v51  ;;  %2059 = vmatpush3.msra.mxu1 %v1038_v29  ;;  %v2841_v51 = vld [vmem:[%s3050_s4 + $0x178] sm:$0xff] }
 0x12c   : > { %2060 = vmatprep.subr.mxu1 %v1037_v31 }
 0x12d   : > { %2061 = vmatpush3.msra.mxu1 %v1037_v31 }
 0x12e   : > { %2062 = vmatprep.subr.mxu1 %v1036_v33 }
 0x12f   : > { %2063 = vmatpush3.msra.mxu1 %v1036_v33 }
 0x130   : > { %2064 = vmatprep.subr.mxu1 %v1035_v35 }
 0x131   : > { %2065 = vmatpush3.msra.mxu1 %v1035_v35 }
 0x132   : > { %v816_v52 = vld [vmem:[#allocation4] sm:$0xf]  ;;  %2066 = vmatprep.subr.mxu1 %v1034_v37 }
 0x133   : > { %2040 = vmatmul.mubr.f32.vlgmr.msra.gmra.mxu0 %v816_v52  ;;  %2067 = vmatpush3.msra.mxu1 %v1034_v37  ;;  %v904_v52 = vld [vmem:[#allocation3] sm:$0x1] }
 0x134   : > { %2081 = vmatpush3.msra.mxu0 %v1668_v53  ;;  %2068 = vmatprep.subr.mxu1 %v1033_v39  ;;  %v949_v53 = vld [vmem:[#allocation3 + $0x1] sm:$0x1] }
 0x135   : > { %2082 = vmatprep.subr.mxu0 %v1667_v54  ;;  %2069 = vmatpush3.msra.mxu1 %v1033_v39  ;;  %v2846_v57 = vmul.f32 0.015625, %v949_v53 }
 0x136   : > { %2083 = vmatpush3.msra.mxu0 %v1667_v54  ;;  %2070 = vmatprep.subr.mxu1 %v1032_v44  ;;  %v2844_v54 = vmul.f32 0.015625, %v904_v52 }
 0x137   : > { %2084 = vmatprep.subr.mxu0 %v1666_v59  ;;  %2071 = vmatpush3.msra.mxu1 %v1032_v44 }
 0x138   : > { %2085 = vmatpush3.msra.mxu0 %v1666_v59  ;;  %2072 = vmatprep.subr.mxu1 %v1031_v49  ;;  %v908_v58 = vmul.f32 64.0, %v2844_v54  ;;  %v952_v59 = vmul.f32 64.0, %v2846_v57 }
 0x139   : > { %2086 = vmatprep.subr.mxu0 %v1665_v62  ;;  %2073 = vmatpush3.msra.mxu1 %v1031_v49 }
 0x13a   : > { %2087 = vmatpush3.msra.mxu0 %v1665_v62  ;;  %2118 = vmatprep.subr.mxu1 %v2841_v51  ;;  %v909_v60 = vmul.f32 %v908_v58, %v2844_v54  ;;  %v953_v62 = vmul.f32 %v952_v59, %v2846_v57 }
 0x13b   : > { %2088 = vmatprep.subr.mxu0 %v1664_v2 }
 0x13c   : > { %2089 = vmatpush3.msra.mxu0 %v1664_v2  ;;  %v910_v2 = vsub.f32 %v907_v0, %v909_v60  ;;  %v954_v8 = vsub.f32 %v951_v4, %v953_v62  ;;  %v2853_v4 = vsub.s32 0, %v2379_v48 }
 0x13d   : > { %2090 = vmatprep.subr.mxu0 %v1663_v5 }
 0x13e   : > { %2091 = vmatpush3.msra.mxu0 %v1663_v5  ;;  %v912_v10 = vmul.f32 0.015873017, %v910_v2 }
 0x13f   : > { %2092 = vmatprep.subr.mxu0 %v1662_v9 }
 0x140   : > { %2093 = vmatpush3.msra.mxu0 %v1662_v9  ;;  %v913_v14 = vadd.f32 1e-05, %v912_v10 }
 0x141   : > { %2094 = vmatprep.subr.mxu0 %v1661_v12 }
 0x142   : > { %2095 = vmatpush3.msra.mxu0 %v1661_v12  ;;  %v955_v12 = vmul.f32 0.015873017, %v954_v8  ;;  %2201 = vrsqrt.f32 %v913_v14  ;;  %vm916_vm4 = vcmp.eq.f32.partialorder %v913_v14, inf  ;;  %v919_v0 = vand.u32 2147483648, %v913_v14 }
 0x143   : > { %2096 = vmatprep.subr.mxu0 %v1660_v15  ;;  %vm918_vm6 = vcmp.eq.f32.partialorder %v913_v14, 0.0 }
 0x144   : > { %2097 = vmatpush3.msra.mxu0 %v1660_v15  ;;  %v956_v29 = vadd.f32 1e-05, %v955_v12 }
 0x145   : > { %2098 = vmatprep.subr.mxu0 %v1659_v30 }
 0x146   : > { %2099 = vmatpush3.msra.mxu0 %v1659_v30  ;;  %2203 = vrsqrt.f32 %v956_v29  ;;  %vm959_vm5 = vcmp.eq.f32.partialorder %v956_v29, inf  ;;  %vm961_vm7 = vcmp.eq.f32.partialorder %v956_v29, 0.0 }
 0x147   : > { %2100 = vmatprep.subr.mxu0 %v1658_v32 }
 0x148   : > { %2101 = vmatpush3.msra.mxu0 %v1658_v32 }
 0x149   : > { %2102 = vmatprep.subr.mxu0 %v1657_v34 }
 0x14a   : > { %2103 = vmatpush3.msra.mxu0 %v1657_v34 }
 0x14b   : > { %2104 = vmatprep.subr.mxu0 %v1656_v36 }
 0x14c   : > { %2105 = vmatpush3.msra.mxu0 %v1656_v36 }
 0x14d   : > { %2106 = vmatprep.subr.mxu0 %v1655_v38 }
 0x14e   : > { %2107 = vmatpush3.msra.mxu0 %v1655_v38 }
 0x14f   : > { %2108 = vmatprep.subr.mxu0 %v1654_v41  ;;  %v2202_v53 = vpop.eup %2201 }
 0x150   : > { %2109 = vmatpush3.msra.mxu0 %v1654_v41  ;;  %v915_v59 = vmul.f32 %v2202_v53, %v913_v14 }
 0x151   : > { %2110 = vmatprep.subr.mxu0 %v1653_v42 }
 0x152   : > { %2111 = vmatpush3.msra.mxu0 %v1653_v42  ;;  %v917_v62 = vsel %vm916_vm4, %v913_v14, %v915_v59 }
 0x153   : > { %2156 = vmatprep.subr.mxu0 %v2229_v3  ;;  %v2204_v58 = vpop.eup %2203 }
 0x154   : > { %v958_v60 = vmul.f32 %v2204_v58, %v956_v29 }
 0x156   : > { %v960_v2 = vsel %vm959_vm5, %v956_v29, %v958_v60 }
 0x1f3   : > { %v899_v5 = vpop.f32.mrf.mxu0 }
 0x1f4   : > { %903 = vst [vmem:[#allocation5] sm:$0xf] %v899_v5  ;;  %v962_v5 = vand.u32 2147483648, %v956_v29 }
 0x1f5   : > { %v2041_v9 = vpop.f32.mrf.mxu0 }
 0x1f6   : > { %v920_v9 = vsel %vm918_vm6, %v919_v0, %v917_v62 }
 0x1fb   : > { %v921_v15 = vld [vmem:[#allocation5] sm:$0x1]  ;;  %v964_v30 = vld [vmem:[#allocation5 + $0x1] sm:$0x1]  ;;  %v924_v37 = vld [vmem:[#allocation5 + $0x2] sm:$0x1] }
 0x1fc   : > { %v923_v31 = vmul.f32 0.00390625, %v921_v15  ;;  %v965_v32 = vmul.f32 0.00390625, %v964_v30  ;;  %v966_v38 = vld [vmem:[#allocation5 + $0x3] sm:$0x1]  ;;  %v963_v15 = vsel %vm961_vm7, %v962_v5, %v960_v2 }
 0x1fe   : > { %v925_v33 = vmul.f32 256.0, %v923_v31  ;;  %v967_v34 = vmul.f32 256.0, %v965_v32 }
 0x200   : > { %v926_v35 = vmul.f32 %v925_v33, %v923_v31  ;;  %v968_v36 = vmul.f32 %v967_v34, %v965_v32 }
 0x202   : > { %v927_v39 = vsub.f32 %v924_v37, %v926_v35  ;;  %v969_v41 = vsub.f32 %v966_v38, %v968_v36 }
 0x204   : > { %v929_v42 = vmul.f32 0.003921569, %v927_v39  ;;  %v970_v44 = vmul.f32 0.003921569, %v969_v41 }
 0x206   : > { %v930_v49 = vadd.f32 1e-05, %v929_v42  ;;  %v971_v52 = vadd.f32 1e-05, %v970_v44 }
 0x208   : > { %2205 = vrsqrt.f32 %v930_v49 }
 0x209   : > { %2207 = vrsqrt.f32 %v971_v52 }
 0x215   : > { %v2206_v8 = vpop.eup %2205 }
 0x216   : > { %v2208_v10 = vpop.eup %2207  ;;  %v932_v12 = vmul.f32 %v2206_v8, %v920_v9 }
 0x217   : > { %v973_v30 = vmul.f32 %v2208_v10, %v963_v15 }
 0x218   : > { %v933_v33 = vmul.f32 %v932_v12, %v923_v31  ;;  %v938_v34 = vrot.slane %v932_v12, %v2853_v4  ;;  %v1670_v12 = vld [vmem:[%s3050_s4 + $0x108] sm:$0xff] }
 0x219   : > { %v974_v35 = vmul.f32 %v973_v30, %v965_v32  ;;  %v979_v36 = vrot.slane %v973_v30, %v2853_v4 }
 0x21a   : > { %v934_v37 = vsub.f32 %v2844_v54, %v933_v33  ;;  %v939_v14 = vmul.f32 %v938_v34, %v2723_v45  ;;  %v940_v29 = vmul.f32 %v938_v34, %v2721_v40 }
 0x21b   : > { %v975_v38 = vsub.f32 %v2846_v57, %v974_v35  ;;  %v980_v41 = vmul.f32 %v979_v36, %v2733_v61  ;;  %v981_v42 = vmul.f32 %v979_v36, %v2731_v56 }
 0x21c   : > { %v944_v39 = vrot.slane %v934_v37, %v2853_v4 }
 0x21d   : > { %v985_v31 = vrot.slane %v975_v38, %v2853_v4 }
 0x21e   : > { %v945_v44 = vadd.f32 %v944_v39, %v939_v14  ;;  %v946_v32 = vadd.f32 %v944_v39, %v940_v29 }
 0x21f   : > { %v986_v49 = vadd.f32 %v985_v31, %v980_v41  ;;  %v987_v52 = vadd.f32 %v985_v31, %v981_v42 }
 0x220   : > { %v2865_v53 = vmax.f32 %v945_v44, 0.0  ;;  %v2867_v54 = vmax.f32 %v946_v32, 0.0 }
 0x221   : > { %v2869_v57 = vmax.f32 %v986_v49, 0.0  ;;  %v2871_v45 = vmax.f32 %v987_v52, 0.0 }
 0x222   : > { %v990_v40 = vrot.slane %v2865_v53, 7  ;;  %2112 = vmatprep.mubr.f32.mxu0 %v2865_v53  ;;  %v991_v56 = vrot.slane %v2867_v54, 7  ;;  %v1002_v59 = vrot.slane %v2865_v53, 1  ;;  %v1003_v5 = vrot.slane %v2867_v54, 1 }
 0x223   : > { %2113 = vmatmul.mubr.f32.vlgmr.msra.gmra.mxu0 %v2867_v54  ;;  %v992_v61 = vrot.slane %v2869_v57, 7  ;;  %v993_v58 = vrot.slane %v2871_v45, 7 }
 0x224   : > { %2115 = vmatprep.mubr.f32.mxu0 %v2869_v57  ;;  %v996_v60 = vsel %vm449_vm1, %v990_v40, %v991_v56  ;;  %2157 = vmatpush3.msra.mxu0 %v2613_v46 }
 0x225   : > { %v997_v62 = vsel %vm449_vm1, %v993_v58, %v990_v40  ;;  %v999_v0 = vmul.f32 %v996_v60, %v2431_v11  ;;  %v995_v2 = vsel %vm449_vm1, %v991_v56, %v992_v61  ;;  %2158 = vmatprep.subr.mxu0 %v2229_v3  ;;  %v1683_v11 = vld [vmem:[%s3050_s4 + $0x170] sm:$0xff]  ;;  %v994_v9 = vsel %vm449_vm1, %v992_v61, %v993_v58 }
 0x226   : > { %v998_v8 = vmul.f32 %v997_v62, %v2415_v7  ;;  %2159 = vmatpush3.msra.mxu0 %v2620_v55  ;;  %v1000_v46 = vmul.f32 %v995_v2, %v2525_v43  ;;  %v1008_v7 = vsel %vm462_vm3, %v1002_v59, %v1003_v5  ;;  %v1682_v43 = vld [vmem:[%s3050_s4 + $0x168] sm:$0xff]  ;;  %v1001_v55 = vmul.f32 %v994_v9, %v2540_v50  ;;  %v1679_v50 = vld [vmem:[%s3050_s4 + $0x150] sm:$0xff] }
 0x227   : > { %2116 = vmatmul.mubr.f32.gmra.mxu0 %v2871_v45  ;;  %2160 = vmatprep.subr.mxu0 %v2229_v3  ;;  %v1010_v10 = vmul.f32 %v2568_v63, %v1008_v7  ;;  %v1678_v63 = vld [vmem:[%s3050_s4 + $0x148] sm:$0xff] }
 0x228   : > { %2074 = vmatprep.mubr.f32.mxu1 %v998_v8  ;;  %2161 = vmatpush3.msra.mxu0 %v2627_v47  ;;  %v1681_v47 = vld [vmem:[%s3050_s4 + $0x160] sm:$0xff] }
 0x229   : > { %2075 = vmatmul.mubr.f32.vlgmr.msra.gmra.mxu1 %v999_v0  ;;  %2162 = vmatprep.subr.mxu0 %v2229_v3 }
 0x22a   : > { %2119 = vmatpush3.msra.mxu1 %v2841_v51  ;;  %2077 = vmatprep.mubr.f32.mxu1 %v1000_v46  ;;  %v1680_v51 = vld [vmem:[%s3050_s4 + $0x158] sm:$0xff] }
 0x22b   : > { %2120 = vmatprep.subr.mxu1 %v1683_v11  ;;  %2163 = vmatpush3.msra.mxu0 %v2634_v16  ;;  %v1677_v16 = vld [vmem:[%s3050_s4 + $0x140] sm:$0xff] }
 0x22c   : > { %2121 = vmatpush3.msra.mxu1 %v1683_v11  ;;  %2164 = vmatprep.subr.mxu0 %v2229_v3 }
 0x22d   : > { %2122 = vmatprep.subr.mxu1 %v1682_v43  ;;  %2078 = vmatmul.mubr.f32.gmra.mxu1 %v1001_v55 }
 0x22e   : > { %2123 = vmatpush3.msra.mxu1 %v1682_v43  ;;  %2150 = vmatprep.mubr.f32.mxu1 %v1010_v10 }
 0x22f   : > { %2124 = vmatprep.subr.mxu1 %v1681_v47  ;;  %2165 = vmatpush3.msra.mxu0 %v2641_v17  ;;  %v1676_v17 = vld [vmem:[%s3050_s4 + $0x138] sm:$0xff] }
 0x230   : > { %2125 = vmatpush3.msra.mxu1 %v1681_v47  ;;  %2166 = vmatprep.subr.mxu0 %v2229_v3 }
 0x231   : > { %2126 = vmatprep.subr.mxu1 %v1680_v51  ;;  %2167 = vmatpush3.msra.mxu0 %v2648_v18  ;;  %v1675_v18 = vld [vmem:[%s3050_s4 + $0x130] sm:$0xff] }
 0x232   : > { %2127 = vmatpush3.msra.mxu1 %v1680_v51  ;;  %2168 = vmatprep.subr.mxu0 %v2229_v3 }
 0x233   : > { %2128 = vmatprep.subr.mxu1 %v1679_v50  ;;  %2169 = vmatpush3.msra.mxu0 %v2655_v19  ;;  %v1674_v19 = vld [vmem:[%s3050_s4 + $0x128] sm:$0xff] }
 0x234   : > { %2129 = vmatpush3.msra.mxu1 %v1679_v50  ;;  %2170 = vmatprep.subr.mxu0 %v2229_v3 }
 0x235   : > { %2130 = vmatprep.subr.mxu1 %v1678_v63  ;;  %2171 = vmatpush3.msra.mxu0 %v2662_v20  ;;  %v1673_v20 = vld [vmem:[%s3050_s4 + $0x120] sm:$0xff] }
 0x236   : > { %2131 = vmatpush3.msra.mxu1 %v1678_v63  ;;  %2172 = vmatprep.subr.mxu0 %v2229_v3 }
 0x237   : > { %2132 = vmatprep.subr.mxu1 %v1677_v16  ;;  %2173 = vmatpush3.msra.mxu0 %v2669_v21  ;;  %v1672_v21 = vld [vmem:[%s3050_s4 + $0x118] sm:$0xff] }
 0x238   : > { %2133 = vmatpush3.msra.mxu1 %v1677_v16  ;;  %2174 = vmatprep.subr.mxu0 %v2229_v3 }
 0x239   : > { %2134 = vmatprep.subr.mxu1 %v1676_v17  ;;  %2175 = vmatpush3.msra.mxu0 %v2676_v22  ;;  %v1004_v22 = vrot.slane %v2869_v57, 1 }
 0x23a   : > { %2135 = vmatpush3.msra.mxu1 %v1676_v17  ;;  %2176 = vmatprep.subr.mxu0 %v2229_v3 }
 0x23b   : > { %2136 = vmatprep.subr.mxu1 %v1675_v18  ;;  %2177 = vmatpush3.msra.mxu0 %v2683_v23  ;;  %v1671_v23 = vld [vmem:[%s3050_s4 + $0x110] sm:$0xff] }
 0x23c   : > { %2137 = vmatpush3.msra.mxu1 %v1675_v18  ;;  %2178 = vmatprep.subr.mxu0 %v2229_v3 }
 0x23d   : > { %2138 = vmatprep.subr.mxu1 %v1674_v19  ;;  %2179 = vmatpush3.msra.mxu0 %v2690_v24  ;;  %v1005_v24 = vrot.slane %v2871_v45, 1 }
 0x23e   : > { %2139 = vmatpush3.msra.mxu1 %v1674_v19  ;;  %2180 = vmatprep.subr.mxu0 %v2229_v3 }
 0x23f   : > { %2140 = vmatprep.subr.mxu1 %v1673_v20  ;;  %2181 = vmatpush3.msra.mxu0 %v2697_v25  ;;  %v1669_v25 = vld [vmem:[%s3050_s4 + $0x100] sm:$0xff]  ;;  %v1006_v15 = vsel %vm462_vm3, %v1004_v22, %v1005_v24  ;;  %v1009_v33 = vsel %vm462_vm3, %v1005_v24, %v1002_v59 }
 0x240   : > { %2141 = vmatpush3.msra.mxu1 %v1673_v20  ;;  %2182 = vmatprep.subr.mxu0 %v2229_v3  ;;  %v1012_v30 = vmul.f32 %v2588_v6, %v1006_v15  ;;  %v1013_v34 = vmul.f32 %v2598_v13, %v1009_v33  ;;  %v1488_v24 = vld [vmem:[#allocation3 + $0x1] sm:$0x1]  ;;  %v1449_v33 = vld [vmem:[#allocation3 + $0x2] sm:$0x1] }
 0x241   : > { %2142 = vmatprep.subr.mxu1 %v1672_v21  ;;  %2183 = vmatpush3.msra.mxu0 %v2702_v26  ;;  %v1007_v26 = vsel %vm462_vm3, %v1003_v5, %v1004_v22 }
 0x242   : > { %2143 = vmatpush3.msra.mxu1 %v1672_v21  ;;  %2184 = vmatprep.subr.mxu0 %v2229_v3 }
 0x243   : > { %2144 = vmatprep.subr.mxu1 %v1671_v23  ;;  %2185 = vmatpush3.msra.mxu0 %v2709_v27  ;;  %v1011_v27 = vmul.f32 %v2575_v1, %v1007_v26 }
 0x244   : > { %2145 = vmatpush3.msra.mxu1 %v1671_v23  ;;  %2186 = vmatprep.subr.mxu0 %v2229_v3  ;;  %v1447_v23 = vld [vmem:[#allocation3] sm:$0x1] }
 0x245   : > { %2146 = vmatprep.subr.mxu1 %v1670_v12  ;;  %2187 = vmatpush3.msra.mxu0 %v2716_v28 }
 0x246   : > { %2147 = vmatpush3.msra.mxu1 %v1670_v12  ;;  %2188 = vmatprep.mubr.msk.f32.mxu0 %vm2230_vm2, %v2229_v3  ;;  %v3016_v12 = vmul.f32 0.015625, %v1447_v23 }
 0x247   : > { %2148 = vmatprep.subr.mxu1 %v1669_v25 }
 0x248   : > { %2149 = vmatpush3.msra.mxu1 %v1669_v25  ;;  %v3018_v25 = vmul.f32 0.015625, %v1488_v24  ;;  %v1450_v26 = vmul.f32 64.0, %v3016_v12 }
 0x249   : > { %2151 = vmatmul.mubr.f32.vlgmr.msra.gmra.mxu1 %v1011_v27 }
 0x24a   : > { %2153 = vmatprep.mubr.f32.mxu1 %v1012_v30  ;;  %v1491_v15 = vmul.f32 64.0, %v3018_v25  ;;  %v1451_v27 = vmul.f32 %v1450_v26, %v3016_v12 }
 0x24c   : > { %v1492_v30 = vmul.f32 %v1491_v15, %v3018_v25 }
 0x24d   : > { %2154 = vmatmul.mubr.f32.gmra.mxu1 %v1013_v34  ;;  %v1452_v34 = vsub.f32 %v1449_v33, %v1451_v27  ;;  %v2218_v33 = vld [vmem:[%s2360_s30 + $0x8] sm:$0xff] }
 0x2e3   : > { %v2114_v36 = vpop.f32.mrf.mxu0 }
 0x2e5   : > { %v1198_v37 = vpop.f32.mrf.mxu0 }
 0x2e7   : > { %v2117_v1 = vpop.f32.mrf.mxu0 }
 0x2e9   : > { %v2076_v28 = vpop.f32.mrf.mxu1  ;;  %v1208_v48 = vpop.f32.mrf.mxu0 }
 0x2ea   : > { %v1204_v14 = vadd.f32 %v2114_v36, %v2076_v28  ;;  %v1490_v28 = vld [vmem:[#allocation3 + $0x3] sm:$0x1] }
 0x2eb   : > { %v1113_v35 = vpop.f32.mrf.mxu1 }
 0x2ec   : > { %v1199_v6 = vadd.f32 %v1198_v37, %v1113_v35  ;;  %v1493_v35 = vsub.f32 %v1490_v28, %v1492_v30  ;;  %v1453_v37 = vmul.f32 0.015873017, %v1452_v34  ;;  %v2219_v34 = vld [vmem:[%s2360_s30 + $0x10] sm:$0xff]  ;;  %v2220_v28 = vld [vmem:[%s2360_s30 + $0x18] sm:$0xff] }
 0x2ed   : > { %v2079_v3 = vpop.f32.mrf.mxu1 }
 0x2ee   : > { %v1214_v42 = vadd.f32 %v2117_v1, %v2079_v3  ;;  %v1454_v1 = vadd.f32 1e-05, %v1453_v37 }
 0x2ef   : > { %v1123_v38 = vpop.f32.mrf.mxu1 }
 0x2f0   : > { %v1209_v44 = vadd.f32 %v1208_v48, %v1123_v38  ;;  %v1494_v38 = vmul.f32 0.015873017, %v1493_v35  ;;  %2209 = vrsqrt.f32 %v1454_v1  ;;  %vm1457_vm8 = vcmp.eq.f32.partialorder %v1454_v1, inf }
 0x2f1   : > { %vm1459_vm10 = vcmp.eq.f32.partialorder %v1454_v1, 0.0 }
 0x309   : > { %v2152_v39 = vpop.f32.mrf.mxu1 }
 0x30a   : > { %v2996_v29 = vadd.f32 %v2152_v39, %v1204_v14  ;;  %v1495_v14 = vadd.f32 1e-05, %v1494_v38 }
 0x30b   : > { %v1300_v41 = vpop.f32.mrf.mxu1 }
 0x30c   : > { %v2998_v31 = vadd.f32 %v1300_v41, %v1199_v6  ;;  %v1332_v32 = vmul.f32 %v2996_v29, %v2996_v29  ;;  %2211 = vrsqrt.f32 %v1495_v14  ;;  %vm1498_vm9 = vcmp.eq.f32.partialorder %v1495_v14, inf }
 0x30d   : > { %v2155_v13 = vpop.f32.mrf.mxu1  ;;  %vm1500_vm11 = vcmp.eq.f32.partialorder %v1495_v14, 0.0 }
 0x30e   : > { %v1323_v49 = vadd.f32 %v2996_v29, %v2998_v31  ;;  %v1331_v52 = vmul.f32 %v2998_v31, %v2998_v31  ;;  %v3006_v53 = vadd.f32 %v2155_v13, %v1214_v42 }
 0x30f   : > { %v1310_v54 = vpop.f32.mrf.mxu1 }
 0x310   : > { %v1324_v57 = vrot.slane %v1323_v49, 4  ;;  %v1333_v45 = vadd.f32 %v1332_v32, %v1331_v52  ;;  %v3008_v40 = vadd.f32 %v1310_v54, %v1209_v44  ;;  %v1350_v56 = vmul.f32 %v3006_v53, %v3006_v53 }
 0x312   : > { %v1325_v61 = vadd.f32 %v1324_v57, %v1323_v49  ;;  %v1334_v58 = vrot.slane %v1333_v45, 4  ;;  %v1341_v59 = vadd.f32 %v3006_v53, %v3008_v40  ;;  %v1349_v60 = vmul.f32 %v3008_v40, %v3008_v40 }
 0x314   : > { %v1326_v62 = vrot.slane %v1325_v61, 2  ;;  %v1335_v0 = vadd.f32 %v1334_v58, %v1333_v45  ;;  %v1342_v2 = vrot.slane %v1341_v59, 4  ;;  %v1351_v5 = vadd.f32 %v1350_v56, %v1349_v60 }
 0x316   : > { %v1327_v8 = vadd.f32 %v1326_v62, %v1325_v61  ;;  %v1336_v46 = vrot.slane %v1335_v0, 2  ;;  %v1343_v11 = vadd.f32 %v1342_v2, %v1341_v59  ;;  %v1352_v9 = vrot.slane %v1351_v5, 4  ;;  %v2210_v59 = vpop.eup %2209 }
 0x317   : > { %v1456_v62 = vmul.f32 %v2210_v59, %v1454_v1 }
 0x318   : > { %v1328_v7 = vrot.slane %v1327_v8, 1  ;;  %v1337_v43 = vadd.f32 %v1336_v46, %v1335_v0  ;;  %v1344_v55 = vrot.slane %v1343_v11, 2  ;;  %v1353_v47 = vadd.f32 %v1352_v9, %v1351_v5 }
 0x319   : > { %v2212_v60 = vpop.eup %2211  ;;  %v1458_v2 = vsel %vm1457_vm8, %v1454_v1, %v1456_v62  ;;  %v1460_v5 = vand.u32 2147483648, %v1454_v1  ;;  %v1501_v46 = vand.u32 2147483648, %v1495_v14 }
 0x31a   : > { %v1329_v10 = vadd.f32 %v1328_v7, %v1327_v8  ;;  %v1338_v51 = vrot.slane %v1337_v43, 1  ;;  %v1345_v50 = vadd.f32 %v1344_v55, %v1343_v11  ;;  %v1354_v63 = vrot.slane %v1353_v47, 2 }
 0x31b   : > { %v1497_v0 = vmul.f32 %v2212_v60, %v1495_v14  ;;  %v1461_v9 = vsel %vm1459_vm10, %v1460_v5, %v1458_v2 }
 0x31c   : > { %1330 = vst [vmem:[#allocation4] sm:$0x1] %v1329_v10  ;;  %v1339_v16 = vadd.f32 %v1338_v51, %v1337_v43  ;;  %v1346_v17 = vrot.slane %v1345_v50, 1  ;;  %v1355_v18 = vadd.f32 %v1354_v63, %v1353_v47 }
 0x31d   : > { %v1499_v8 = vsel %vm1498_vm9, %v1495_v14, %v1497_v0 }
 0x31e   : > { %1340 = vst [vmem:[#allocation4 + $0x2] sm:$0x1] %v1339_v16  ;;  %v1347_v19 = vadd.f32 %v1346_v17, %v1345_v50  ;;  %v1356_v20 = vrot.slane %v1355_v18, 1  ;;  %v1502_v55 = vsel %vm1500_vm11, %v1501_v46, %v1499_v8 }
 0x320   : > { %1348 = vst [vmem:[#allocation4 + $0x1] sm:$0x1] %v1347_v19  ;;  %v1357_v21 = vadd.f32 %v1356_v20, %v1355_v18 }
 0x322   : > { %1358 = vst [vmem:[#allocation4 + $0x3] sm:$0x1] %v1357_v21 }
 0x329   : > { %v1359_v22 = vld [vmem:[#allocation4] sm:$0xf] }
 0x32a   : > { %2189 = vmatmul.mubr.f32.vlgmr.msra.gmra.mxu0 %v1359_v22 }
 0x3ea   : > { %v1442_v36 = vpop.f32.mrf.mxu0 }
 0x3eb   : > { %1446 = vst [vmem:[#allocation5] sm:$0xf] %v1442_v36 }
 0x3ec   : > { %v2190_v3 = vpop.f32.mrf.mxu0 }
 0x3f2   : > { %v1462_v39 = vld [vmem:[#allocation5] sm:$0x1]  ;;  %v1503_v6 = vld [vmem:[#allocation5 + $0x1] sm:$0x1]  ;;  %v1464_v49 = vld [vmem:[#allocation5 + $0x2] sm:$0x1] }
 0x3f3   : > { %v1463_v41 = vmul.f32 0.00390625, %v1462_v39  ;;  %v1504_v48 = vmul.f32 0.00390625, %v1503_v6  ;;  %v1505_v52 = vld [vmem:[#allocation5 + $0x3] sm:$0x1] }
 0x3f5   : > { %v1465_v42 = vmul.f32 256.0, %v1463_v41  ;;  %v1506_v44 = vmul.f32 256.0, %v1504_v48 }
 0x3f7   : > { %v1466_v13 = vmul.f32 %v1465_v42, %v1463_v41  ;;  %v1507_v32 = vmul.f32 %v1506_v44, %v1504_v48 }
 0x3f9   : > { %v1467_v54 = vsub.f32 %v1464_v49, %v1466_v13  ;;  %v1508_v57 = vsub.f32 %v1505_v52, %v1507_v32 }
 0x3fb   : > { %v1468_v45 = vmul.f32 0.003921569, %v1467_v54  ;;  %v1509_v56 = vmul.f32 0.003921569, %v1508_v57 }
 0x3fd   : > { %v1469_v61 = vadd.f32 1e-05, %v1468_v45  ;;  %v1510_v58 = vadd.f32 1e-05, %v1509_v56 }
 0x3ff   : > { %2213 = vrsqrt.f32 %v1469_v61 }
 0x400   : > { %2215 = vrsqrt.f32 %v1510_v58 }
 0x40c   : > { %v2214_v11 = vpop.eup %2213 }
 0x40d   : > { %v2216_v7 = vpop.eup %2215  ;;  %v1471_v43 = vmul.f32 %v2214_v11, %v1461_v9 }
 0x40e   : > { %v1512_v47 = vmul.f32 %v2216_v7, %v1502_v55 }
 0x40f   : > { %v1472_v10 = vmul.f32 %v1471_v43, %v1463_v41  ;;  %v1477_v51 = vrot.slane %v1471_v43, %v2853_v4 }
 0x410   : > { %v1513_v50 = vmul.f32 %v1512_v47, %v1504_v48  ;;  %v1518_v63 = vrot.slane %v1512_v47, %v2853_v4 }
 0x411   : > { %v1473_v16 = vsub.f32 %v3016_v12, %v1472_v10  ;;  %v1478_v18 = vmul.f32 %v1477_v51, %v2998_v31  ;;  %v1479_v19 = vmul.f32 %v1477_v51, %v2996_v29 }
 0x412   : > { %v1514_v17 = vsub.f32 %v3018_v25, %v1513_v50  ;;  %v1519_v21 = vmul.f32 %v1518_v63, %v3008_v40  ;;  %v1520_v22 = vmul.f32 %v1518_v63, %v3006_v53  ;;  %v2217_v40 = vld [vmem:[%s2360_s30] sm:$0xff] }
 0x413   : > { %v1483_v20 = vrot.slane %v1473_v16, %v2853_v4 }
 0x414   : > { %v1524_v23 = vrot.slane %v1514_v17, %v2853_v4 }
 0x415   : > { %v1484_v24 = vadd.f32 %v1483_v20, %v1478_v18  ;;  %v1485_v12 = vadd.f32 %v1483_v20, %v1479_v19 }
 0x416   : > { %v1525_v26 = vadd.f32 %v1524_v23, %v1519_v21  ;;  %v1526_v25 = vadd.f32 %v1524_v23, %v1520_v22 }
 0x417   : > { %v1486_v15 = vmax.f32 %v1484_v24, 0.0  ;;  %v1487_v27 = vmax.f32 %v1485_v12, 0.0 }
 0x418   : > { %v1527_v29 = vmax.f32 %v1525_v26, 0.0  ;;  %v1528_v31 = vmax.f32 %v1526_v25, 0.0 }
 0x419   : > { %v1529_v30 = vadd.f32 %v2217_v40, %v1486_v15  ;;  %v1530_v53 = vadd.f32 %v2218_v33, %v1487_v27 }
 0x41a   : > { %v1531_v4 = vadd.f32 %v2219_v34, %v1527_v29  ;;  %v1532_v35 = vadd.f32 %v2220_v28, %v1528_v31 }
 0x41b   : > { %1533 = vst [vmem:[%s302_s17] sm:$0xff] %v1529_v30  ;;  %1534 = vst [vmem:[%s302_s17 + $0x8] sm:$0xff] %v1530_v53 }
 0x41c   : > { %1535 = vst [vmem:[%s302_s17 + $0x10] sm:$0xff] %v1531_v4  ;;  %1536 = vst [vmem:[%s302_s17 + $0x18] sm:$0xff] %v1532_v35 }
 0x41d PF: > { %s17_s24 = sadd.s32 1, %s2227_s24  }
 0x41e   : > { %p14_p5 = scmp.ge.s32.totalorder %s17_s24, 4  }
 0x420   :  { %16 = sbr.rel (!%p14_p5) target bundleno = 1 (0x1), region = 87 }

</bundles_post_ra>
